<compile_context>
chip_gen: v7x
topology: tpu7x:2x2x1
jax: 0.10.0
libtpu: 0.0.40
codegen_flags: <defaults>
</compile_context>

<pallas_src>
import functools

import jax
import jax.numpy as jnp
from jax import lax
from jax.experimental import pallas as pl
from jax.experimental.pallas import tpu as pltpu


def upconv_kernel(x_ref, w_ref, o_ref):
    # x_ref: (1, 1, TB+2, W+2, C)  bf16 padded input row-band (2-row halo)
    # w_ref: (2, 6C, 2C)           bf16 fused per-row-phase weights
    # o_ref: (1, TB, 2, W, 2C)     f32 phase-interleaved output block
    TB = o_ref.shape[1]
    W = o_ref.shape[3]
    K6 = w_ref.shape[1]          # 6C  (2 row shifts x 3 col shifts, ci inner)
    C2 = w_ref.shape[2]          # 2C  (both column phases)

    for p in range(2):
        # im2col slab for row-phase p: row shifts {p, p+1} x col shifts {0,1,2}
        xs = jnp.concatenate(
            [x_ref[0, 0, p + dr:p + dr + TB, dc:dc + W, :]
             for dr in (0, 1) for dc in (0, 1, 2)],
            axis=-1).reshape(TB * W, K6)
        # one fused MXU contraction covers both column phases (f32 accumulate)
        acc = jnp.dot(xs, w_ref[p], preferred_element_type=jnp.float32)
        # single dense store of the full (TB, W, 2C) slab — no masked stores
        o_ref[0, :, p, :, :] = acc.reshape(TB, W, C2).astype(o_ref.dtype)


def _pick_band_rows(H, W, C, budget_bytes=10 << 20):
    """Largest divisor of H whose block working set (bufs + temps) fits."""
    def est(tb):
        c_in = max(C, 128)               # lane padding for small C
        c_out = max(2 * C, 128)
        in_b = (tb + 2) * (W + 2) * c_in * 2          # bf16 input band
        out_b = tb * 2 * W * c_out * 4                # f32 output block
        tmp_b = tb * W * (6 * c_in * 2 + c_out * 4)   # im2col slab + f32 acc
        return 2 * (in_b + out_b) + tmp_b             # in/out double-buffered
    for tb in sorted((d for d in range(1, H + 1) if H % d == 0), reverse=True):
        if est(tb) <= budget_bytes:
            return tb
    return 1


def _fused_phase_weights(w_torch):
    """(C, C, 4, 4) ConvTranspose2d weight -> (2, 6C, 2C) bf16 fused weights.

    Row order of the 6C contraction dim matches the kernel's concat order
    ((row shift dr, col shift dc) outer, ci inner); column block q holds the
    output channels of column phase q.  Taps: kh = 3 - p - 2a, kw = 3 - q - 2b
    with row shift dr = a, col shift dc = q + b; unused (shift, phase) pairs
    are structural zeros.
    """
    C = w_torch.shape[0]
    wt = w_torch.astype(jnp.bfloat16)
    zeros = jnp.zeros((C, C), jnp.bfloat16)

    def wblock(p):
        kh0, kh1 = 3 - p, 1 - p                      # row shifts 0, 1
        col_q0 = jnp.concatenate(
            [wt[:, :, kh0, 3], wt[:, :, kh0, 1], zeros,
             wt[:, :, kh1, 3], wt[:, :, kh1, 1], zeros], axis=0)   # (6C, C)
        col_q1 = jnp.concatenate(
            [zeros, wt[:, :, kh0, 2], wt[:, :, kh0, 0],
             zeros, wt[:, :, kh1, 2], wt[:, :, kh1, 0]], axis=0)   # (6C, C)
        return jnp.concatenate([col_q0, col_q1], axis=1)           # (6C, 2C)

    return jnp.stack([wblock(0), wblock(1)], axis=0)               # (2, 6C, 2C)


@functools.partial(jax.jit, static_argnames=("band_rows",))
def upconv(x_nchw, w_torch, *, band_rows=None):
    """ConvTranspose2d(C, C, k=4, s=2, p=1, bias=False) forward.

    x_nchw:  (N, C, H, W)   float32
    w_torch: (C, C, 4, 4)   PyTorch ConvTranspose2d weight (ci, co, kh, kw)
    returns: (N, C, 2H, 2W) float32
    """
    N, C, H, W = x_nchw.shape

    # glue: NCHW -> NHWC, bf16, pad spatially by 1 (NO zero-stuffing)
    x = jnp.transpose(x_nchw, (0, 2, 3, 1)).astype(jnp.bfloat16)
    xp = jnp.pad(x, ((0, 0), (1, 1), (1, 1), (0, 0)))          # (N, H+2, W+2, C)

    TB = band_rows if band_rows is not None else _pick_band_rows(H, W, C)
    assert H % TB == 0, (H, TB)
    nbands = H // TB
    if nbands == 1:
        xb = xp[:, None]                                       # (N, 1, H+2, W+2, C)
    else:
        # row bands with a 2-row halo (duplicates only 2 rows per band)
        rows = jnp.arange(nbands)[:, None] * TB + jnp.arange(TB + 2)[None, :]
        xb = xp[:, rows]                                       # (N, nbands, TB+2, W+2, C)

    wph = _fused_phase_weights(w_torch)                        # (2, 6C, 2C)

    out = pl.pallas_call(
        upconv_kernel,
        out_shape=jax.ShapeDtypeStruct((N, H, 2, W, 2 * C), jnp.float32),
        grid_spec=pltpu.PrefetchScalarGridSpec(
            num_scalar_prefetch=0,
            grid=(N, nbands),
            in_specs=[
                pl.BlockSpec((1, 1, TB + 2, W + 2, C),
                             lambda n, b: (n, b, 0, 0, 0)),
                pl.BlockSpec((2, 6 * C, 2 * C),
                             lambda n, b: (0, 0, 0)),
            ],
            out_specs=pl.BlockSpec((1, TB, 2, W, 2 * C),
                                   lambda n, b: (n, b, 0, 0, 0)),
        ),
        compiler_params=pltpu.CompilerParams(
            dimension_semantics=("parallel", "parallel"),
            vmem_limit_bytes=32 * 1024 * 1024,
        ),
    )(xb, wph)

    # free reshape: (N, H, 2, W, 2C) -> (N, 2H, 2W, C); then back to NCHW
    out = out.reshape(N, 2 * H, 2 * W, C)
    return jnp.transpose(out, (0, 3, 1, 2)).astype(x_nchw.dtype)


def upconv_reference(x_nchw, w_torch):
    """Pure-JAX reference (same bf16 compute dtype / f32 accumulation)."""
    w_conv = jnp.transpose(w_torch[:, :, ::-1, ::-1], (1, 0, 2, 3))  # (co, ci, 4, 4)
    return lax.conv_general_dilated(
        x_nchw.astype(jnp.bfloat16), w_conv.astype(jnp.bfloat16),
        window_strides=(1, 1), padding=((2, 2), (2, 2)),
        lhs_dilation=(2, 2),
        dimension_numbers=("NCHW", "OIHW", "NCHW"),
        preferred_element_type=jnp.float32).astype(x_nchw.dtype)


if __name__ == "__main__":
    key = jax.random.PRNGKey(0)
    kx, kw = jax.random.split(key)

    N, C, H, W = 2, 4, 16, 16
    x = jax.random.normal(kx, (N, C, H, W), dtype=jnp.float32)
    # ConvTranspose2d weight shape: (in_channels, out_channels, kH, kW)
    w = jax.random.normal(kw, (C, C, 4, 4), dtype=jnp.float32) * 0.1

    ref = jax.block_until_ready(upconv_reference(x, w))

    # single-band path (whole image per grid step)
    out = jax.block_until_ready(upconv(x, w))
    assert out.shape == (N, C, 2 * H, 2 * W), out.shape
    assert jnp.allclose(out, ref, atol=1e-2, rtol=1e-2), \
        float(jnp.max(jnp.abs(out - ref)))

    # multi-band path (row-band tiling with 2-row halo)
    out_b = jax.block_until_ready(upconv(x, w, band_rows=8))
    assert jnp.allclose(out_b, ref, atol=1e-2, rtol=1e-2), \
        float(jnp.max(jnp.abs(out_b - ref)))

    print("KERNEL_OK")
</pallas_src>

<mosaic_0001>
module attributes {stable_mosaic.version = 11 : i64} {
  func.func @upconv_kernel(%arg0: i32, %arg1: i32, %arg2: memref<1x1x18x18x4xbf16, #tpu.memory_space<vmem>>, %arg3: memref<2x24x8xbf16, #tpu.memory_space<vmem>>, %arg4: memref<1x16x2x16x8xf32, #tpu.memory_space<vmem>>) attributes {dimension_semantics = [#tpu.dimension_semantics<parallel>, #tpu.dimension_semantics<parallel>], iteration_bounds = array<i64: 2, 1>, scalar_prefetch = 0 : i64, scratch_operands = 0 : i64, tpu.core_type = #tpu.core_type<tc>, window_params = [{transform_indices = @transform_0, window_bounds = array<i64: 1, 1, 18, 18, 4>}, {pipeline_mode = #tpu.pipeline_mode<synchronous>, transform_indices = @transform_1, window_bounds = array<i64: 2, 24, 8>}, {transform_indices = @transform_2, window_bounds = array<i64: 1, 16, 2, 16, 8>}]} {
    %c0 = arith.constant 0 : index
    %c0_0 = arith.constant 0 : index
    %c0_1 = arith.constant 0 : index
    %c0_2 = arith.constant 0 : index
    %c0_3 = arith.constant 0 : index
    %0 = vector.load %arg2[%c0, %c0_0, %c0_1, %c0_2, %c0_3] : memref<1x1x18x18x4xbf16, #tpu.memory_space<vmem>>, vector<1x1x16x16x4xbf16>
    %1 = vector.shape_cast %0 : vector<1x1x16x16x4xbf16> to vector<16x16x4xbf16>
    %c0_4 = arith.constant 0 : index
    %c0_5 = arith.constant 0 : index
    %c0_6 = arith.constant 0 : index
    %c1 = arith.constant 1 : index
    %c0_7 = arith.constant 0 : index
    %2 = vector.load %arg2[%c0_4, %c0_5, %c0_6, %c1, %c0_7] : memref<1x1x18x18x4xbf16, #tpu.memory_space<vmem>>, vector<1x1x16x16x4xbf16>
    %3 = vector.shape_cast %2 : vector<1x1x16x16x4xbf16> to vector<16x16x4xbf16>
    %c0_8 = arith.constant 0 : index
    %c0_9 = arith.constant 0 : index
    %c0_10 = arith.constant 0 : index
    %c2 = arith.constant 2 : index
    %c0_11 = arith.constant 0 : index
    %4 = vector.load %arg2[%c0_8, %c0_9, %c0_10, %c2, %c0_11] : memref<1x1x18x18x4xbf16, #tpu.memory_space<vmem>>, vector<1x1x16x16x4xbf16>
    %5 = vector.shape_cast %4 : vector<1x1x16x16x4xbf16> to vector<16x16x4xbf16>
    %c0_12 = arith.constant 0 : index
    %c0_13 = arith.constant 0 : index
    %c1_14 = arith.constant 1 : index
    %c0_15 = arith.constant 0 : index
    %c0_16 = arith.constant 0 : index
    %6 = vector.load %arg2[%c0_12, %c0_13, %c1_14, %c0_15, %c0_16] : memref<1x1x18x18x4xbf16, #tpu.memory_space<vmem>>, vector<1x1x16x16x4xbf16>
    %7 = vector.shape_cast %6 : vector<1x1x16x16x4xbf16> to vector<16x16x4xbf16>
    %c0_17 = arith.constant 0 : index
    %c0_18 = arith.constant 0 : index
    %c1_19 = arith.constant 1 : index
    %c1_20 = arith.constant 1 : index
    %c0_21 = arith.constant 0 : index
    %8 = vector.load %arg2[%c0_17, %c0_18, %c1_19, %c1_20, %c0_21] : memref<1x1x18x18x4xbf16, #tpu.memory_space<vmem>>, vector<1x1x16x16x4xbf16>
    %9 = vector.shape_cast %8 : vector<1x1x16x16x4xbf16> to vector<16x16x4xbf16>
    %c0_22 = arith.constant 0 : index
    %c0_23 = arith.constant 0 : index
    %c1_24 = arith.constant 1 : index
    %c2_25 = arith.constant 2 : index
    %c0_26 = arith.constant 0 : index
    %10 = vector.load %arg2[%c0_22, %c0_23, %c1_24, %c2_25, %c0_26] : memref<1x1x18x18x4xbf16, #tpu.memory_space<vmem>>, vector<1x1x16x16x4xbf16>
    %11 = vector.shape_cast %10 : vector<1x1x16x16x4xbf16> to vector<16x16x4xbf16>
    %12 = tpu.concatenate %1, %3, %5, %7, %9, %11 in 2 : vector<16x16x4xbf16>, vector<16x16x4xbf16>, vector<16x16x4xbf16>, vector<16x16x4xbf16>, vector<16x16x4xbf16>, vector<16x16x4xbf16> -> vector<16x16x24xbf16>
    %13 = vector.shape_cast %12 : vector<16x16x24xbf16> to vector<256x24xbf16>
    %c0_27 = arith.constant 0 : index
    %c0_28 = arith.constant 0 : index
    %c0_29 = arith.constant 0 : index
    %14 = vector.load %arg3[%c0_27, %c0_28, %c0_29] : memref<2x24x8xbf16, #tpu.memory_space<vmem>>, vector<1x24x8xbf16>
    %15 = vector.shape_cast %14 : vector<1x24x8xbf16> to vector<24x8xbf16>
    %cst = arith.constant dense<0.000000e+00> : vector<256x8xf32>
    %16 = tpu.matmul %13, %15, %cst {dimension_numbers = #tpu.dot_dimension_numbers<[1], [0], [0], [1], [0, 0, 1, 1], [], []>} : vector<256x24xbf16>, vector<24x8xbf16>, vector<256x8xf32> -> vector<256x8xf32>
    %17 = vector.shape_cast %16 : vector<256x8xf32> to vector<16x16x8xf32>
    %c0_30 = arith.constant 0 : index
    %c0_31 = arith.constant 0 : index
    %c0_32 = arith.constant 0 : index
    %c0_33 = arith.constant 0 : index
    %c0_34 = arith.constant 0 : index
    %18 = vector.load %arg4[%c0_30, %c0_31, %c0_32, %c0_33, %c0_34] : memref<1x16x2x16x8xf32, #tpu.memory_space<vmem>>, vector<1x16x1x16x8xf32>
    %19 = vector.shape_cast %18 : vector<1x16x1x16x8xf32> to vector<16x16x8xf32>
    %20 = vector.shape_cast %17 : vector<16x16x8xf32> to vector<1x16x1x16x8xf32>
    tpu.vector_store %arg4[%c0_30, %c0_31, %c0_32, %c0_33, %c0_34], %20 {strides = array<i32>} : memref<1x16x2x16x8xf32, #tpu.memory_space<vmem>>, vector<1x16x1x16x8xf32>,
    %c0_35 = arith.constant 0 : index
    %c0_36 = arith.constant 0 : index
    %c1_37 = arith.constant 1 : index
    %c0_38 = arith.constant 0 : index
    %c0_39 = arith.constant 0 : index
    %21 = vector.load %arg2[%c0_35, %c0_36, %c1_37, %c0_38, %c0_39] : memref<1x1x18x18x4xbf16, #tpu.memory_space<vmem>>, vector<1x1x16x16x4xbf16>
    %22 = vector.shape_cast %21 : vector<1x1x16x16x4xbf16> to vector<16x16x4xbf16>
    %c0_40 = arith.constant 0 : index
    %c0_41 = arith.constant 0 : index
    %c1_42 = arith.constant 1 : index
    %c1_43 = arith.constant 1 : index
    %c0_44 = arith.constant 0 : index
    %23 = vector.load %arg2[%c0_40, %c0_41, %c1_42, %c1_43, %c0_44] : memref<1x1x18x18x4xbf16, #tpu.memory_space<vmem>>, vector<1x1x16x16x4xbf16>
    %24 = vector.shape_cast %23 : vector<1x1x16x16x4xbf16> to vector<16x16x4xbf16>
    %c0_45 = arith.constant 0 : index
    %c0_46 = arith.constant 0 : index
    %c1_47 = arith.constant 1 : index
    %c2_48 = arith.constant 2 : index
    %c0_49 = arith.constant 0 : index
    %25 = vector.load %arg2[%c0_45, %c0_46, %c1_47, %c2_48, %c0_49] : memref<1x1x18x18x4xbf16, #tpu.memory_space<vmem>>, vector<1x1x16x16x4xbf16>
    %26 = vector.shape_cast %25 : vector<1x1x16x16x4xbf16> to vector<16x16x4xbf16>
    %c0_50 = arith.constant 0 : index
    %c0_51 = arith.constant 0 : index
    %c2_52 = arith.constant 2 : index
    %c0_53 = arith.constant 0 : index
    %c0_54 = arith.constant 0 : index
    %27 = vector.load %arg2[%c0_50, %c0_51, %c2_52, %c0_53, %c0_54] : memref<1x1x18x18x4xbf16, #tpu.memory_space<vmem>>, vector<1x1x16x16x4xbf16>
    %28 = vector.shape_cast %27 : vector<1x1x16x16x4xbf16> to vector<16x16x4xbf16>
    %c0_55 = arith.constant 0 : index
    %c0_56 = arith.constant 0 : index
    %c2_57 = arith.constant 2 : index
    %c1_58 = arith.constant 1 : index
    %c0_59 = arith.constant 0 : index
    %29 = vector.load %arg2[%c0_55, %c0_56, %c2_57, %c1_58, %c0_59] : memref<1x1x18x18x4xbf16, #tpu.memory_space<vmem>>, vector<1x1x16x16x4xbf16>
    %30 = vector.shape_cast %29 : vector<1x1x16x16x4xbf16> to vector<16x16x4xbf16>
    %c0_60 = arith.constant 0 : index
    %c0_61 = arith.constant 0 : index
    %c2_62 = arith.constant 2 : index
    %c2_63 = arith.constant 2 : index
    %c0_64 = arith.constant 0 : index
    %31 = vector.load %arg2[%c0_60, %c0_61, %c2_62, %c2_63, %c0_64] : memref<1x1x18x18x4xbf16, #tpu.memory_space<vmem>>, vector<1x1x16x16x4xbf16>
    %32 = vector.shape_cast %31 : vector<1x1x16x16x4xbf16> to vector<16x16x4xbf16>
    %33 = tpu.concatenate %22, %24, %26, %28, %30, %32 in 2 : vector<16x16x4xbf16>, vector<16x16x4xbf16>, vector<16x16x4xbf16>, vector<16x16x4xbf16>, vector<16x16x4xbf16>, vector<16x16x4xbf16> -> vector<16x16x24xbf16>
    %34 = vector.shape_cast %33 : vector<16x16x24xbf16> to vector<256x24xbf16>
    %c1_65 = arith.constant 1 : index
    %c0_66 = arith.constant 0 : index
    %c0_67 = arith.constant 0 : index
    %35 = vector.load %arg3[%c1_65, %c0_66, %c0_67] : memref<2x24x8xbf16, #tpu.memory_space<vmem>>, vector<1x24x8xbf16>
    %36 = vector.shape_cast %35 : vector<1x24x8xbf16> to vector<24x8xbf16>
    %cst_68 = arith.constant dense<0.000000e+00> : vector<256x8xf32>
    %37 = tpu.matmul %34, %36, %cst_68 {dimension_numbers = #tpu.dot_dimension_numbers<[1], [0], [0], [1], [0, 0, 1, 1], [], []>} : vector<256x24xbf16>, vector<24x8xbf16>, vector<256x8xf32> -> vector<256x8xf32>
    %38 = vector.shape_cast %37 : vector<256x8xf32> to vector<16x16x8xf32>
    %c0_69 = arith.constant 0 : index
    %c0_70 = arith.constant 0 : index
    %c1_71 = arith.constant 1 : index
    %c0_72 = arith.constant 0 : index
    %c0_73 = arith.constant 0 : index
    %39 = vector.load %arg4[%c0_69, %c0_70, %c1_71, %c0_72, %c0_73] : memref<1x16x2x16x8xf32, #tpu.memory_space<vmem>>, vector<1x16x1x16x8xf32>
    %40 = vector.shape_cast %39 : vector<1x16x1x16x8xf32> to vector<16x16x8xf32>
    %41 = vector.shape_cast %38 : vector<16x16x8xf32> to vector<1x16x1x16x8xf32>
    tpu.vector_store %arg4[%c0_69, %c0_70, %c1_71, %c0_72, %c0_73], %41 {strides = array<i32>} : memref<1x16x2x16x8xf32, #tpu.memory_space<vmem>>, vector<1x16x1x16x8xf32>,
    return
  }
  func.func @transform_0(%arg0: i32, %arg1: i32) -> (i32, i32, i32, i32, i32) {
    %c0_i32 = arith.constant 0 : i32
    %c0_i32_0 = arith.constant 0 : i32
    %c0_i32_1 = arith.constant 0 : i32
    %c0_i32_2 = arith.constant 0 : i32
    return %arg0, %arg1, %c0_i32, %c0_i32_0, %c0_i32_1 : i32, i32, i32, i32, i32
  }
  func.func @transform_1(%arg0: i32, %arg1: i32) -> (i32, i32, i32) {
    %c0_i32 = arith.constant 0 : i32
    %c0_i32_0 = arith.constant 0 : i32
    %c0_i32_1 = arith.constant 0 : i32
    %c0_i32_2 = arith.constant 0 : i32
    return %c0_i32, %c0_i32_0, %c0_i32_1 : i32, i32, i32
  }
  func.func @transform_2(%arg0: i32, %arg1: i32) -> (i32, i32, i32, i32, i32) {
    %c0_i32 = arith.constant 0 : i32
    %c0_i32_0 = arith.constant 0 : i32
    %c0_i32_1 = arith.constant 0 : i32
    %c0_i32_2 = arith.constant 0 : i32
    return %arg0, %arg1, %c0_i32, %c0_i32_0, %c0_i32_1 : i32, i32, i32, i32, i32
  }
}

</mosaic_0001>

<bundles_post_ra>
// kernel: upconv.1
= control target key start
LH: loop header
LB: loop body
LE: loop exit
PB: predicated region body
PF: predicated region fallthrough
CT: control target
= control target key end

     0   :  { %s4179_s9 = smov 0   ;;  %s4181_s10 = smov 0   ;;  %s5922_s0 = inlined_call_operand.vmem [shape: bf16[2,1,18,18,4], index: 0, kind: input, shape index: {}]   ;;  %s5923_s1 = inlined_call_operand.vmem [shape: bf16[2,24,8], index: 1, kind: input, shape index: {}]   ;;  %s5924_s2 = inlined_call_operand.vmem [shape: f32[2,16,2,16,8], index: 2, kind: output, shape index: {}]  }
   0x1   :  { %s4183_s11 = smov 0  }
   0x2 LB: > { %s24_s12 = sadd.s32 1, %s4153_s10  ;;  %p3337_p0 = scmp.ge.s32.totalorder %s4157_s11, 1  ;;  %s4157_s11 = sphi %s4183_s11, %s12_s11   ;;  %s4153_s10 = sphi %s4181_s10, %s5926_s10   ;;  %s4149_s9 = sphi %s4179_s9, %s5925_s9  }
   0x3   : > { %p26_p1 = scmp.ge.s32.totalorder %s24_s12, 2  ;;  %p132_p2 = scmp.lt.s32.totalorder %s4157_s11, 3 }
   0x5   : > { %s5928_s12 = smov (%p26_p1, %s24_s12), 0  ;;  %p133_p3 = pnand %p3337_p0, %p132_p2 }
   0x6   : > { %p163_p4 = scmp.lt.s32.totalorder (!%p133_p3), %s4149_s9, 1  ;;  %s4159_s17 = smov (!%p133_p3), 12   ;;  %vm714_vm0 = vcmask (!%p133_p3), 1046528   ;;  %vm441_vm1 = vsmask.f32 (!%p133_p3), 7424  ;;  %vm1517_vm2 = vcmask (!%p133_p3), 1043456  }
   0x7   : > { %136 = sbr.rel (%p133_p3) target bundleno = 673 (0x2a1), region = 28  ;;  %s4160_s18 = smov (!%p133_p3), 8   ;;  %vm1307_vm3 = vcmask (!%p133_p3), 31744   ;;  %vm1340_vm4 = vcmask (!%p133_p3), 64512   ;;  %vm1373_vm5 = vcmask (!%p133_p3), 97280   ;;  %vm1406_vm6 = vcmask (!%p133_p3), 130048  }
   0x8   : > { %s4161_s19 = smov (!%p133_p3), 4   ;;  %s4162_s24 = smov (!%p133_p3), 16   ;;  %vm1439_vm7 = vcmask (!%p133_p3), 162816   ;;  %vm1484_vm8 = vcmask (!%p133_p3), 195584  }
   0x9   : > { %s4163_s25 = smov (!%p133_p3), 20  }
   0xe   : > { %s5930_s9 = smov (!%p163_p4, %s4149_s9), 1 }
   0xf   : > { %s3909_s13 = smul.u32 216, %s5930_s9  ;;  %s3798_s30 = sshll.u32 %s5930_s9, 9 }
  0x10   : > { %s5727_s5 = scalar_lea.vmem %s5924_s2, %s3798_s30 }
  0x11   : > { %s4203_s16 = scalar_lea.vmem %s5922_s0, %s3909_s13 }
  0x12   : > { %v3341_v0 = vld [vmem:[%s4203_s16 + $0xc] sm:$0xf]  ;;  %v4207_v1 = vld [vmem:[%s4203_s16 + $0x10] sm:$0xf]  ;;  %v185_v7 = vld [vmem:[%s4203_s16 + $0x4] sm:$0xf] }
  0x13   : > { %v4210_v2 = vcombine.low %v3341_v0, %v4207_v1  ;;  %v187_v3 = vld [vmem:[%s4203_s16 + $0x10] sm:$0xf]  ;;  %v233_v4 = vld [vmem:[%s4203_s16 + $0xc] sm:$0xe]  ;;  %v232_v10 = vld [vmem:[%s4203_s16] sm:$0xe] }
  0x14   : > { %v4215_v5 = vld [vmem:[%s4203_s16 + $0x14] ss:$0 sps:$4 sm:$0x11]   ;;  %v3438_v6 = vcombine.low %v233_v4, %v187_v3  ;;  %v184_v11 = vld [vmem:[%s4203_s16] sm:$0xf]  ;;  %v3437_v15 = vcombine.low %v232_v10, %v185_v7 }
  0x15   : > { %875 = vrot.lane.b32.xlu1 %v4210_v2, %s4159_s17  ;;  %v719_v9 = vrot.slane %v4215_v5, 1  ;;  %v958_v12 = vshll.u32 %v4210_v2, 16  ;;  %v186_v13 = vld [vmem:[%s4203_s16 + $0xc] sm:$0xf]  ;;  %v4227_v17 = vcombine.low %v184_v11, %v185_v7  ;;  %v3521_v18 = vld [vmem:[%s4203_s16 + $0x18] sm:$0xf] }
  0x16   : > { %v718_v8 = vrot.slane %v3438_v6, 1  ;;  %v3944_v14 = vld [vmem:[%s4203_s16 + $0x8] ss:$0 sps:$4 sm:$0x11]   ;;  %v3522_v19 = vld [vmem:[%s4203_s16 + $0x1c] sm:$0xf]  ;;  %v4235_v26 = vcombine.low %v186_v13, %v187_v3 }
  0x17   : > { %v3568_v20 = vld [vmem:[%s4203_s16 + $0x18] sm:$0xe]  ;;  %v715_v21 = vrot.slane %v3437_v15, 1  ;;  %v716_v22 = vrot.slane %v3944_v14, 1  ;;  %v956_v25 = vshrl.u32 %v4210_v2, 16  ;;  %v443_v37 = vshrl.u32 %v4227_v17, 16 }
  0x18   : > { %v720_v16 = vsel %vm714_vm0, %v718_v8, %v719_v9  ;;  %v3948_v23 = vld [vmem:[%s4203_s16 + $0x20] ss:$0 sps:$4 sm:$0x11]   ;;  %v3680_v24 = vcombine.low %v3568_v20, %v3522_v19  ;;  %v3519_v27 = vld [vmem:[%s4203_s16 + $0xc] sm:$0xf]  ;;  %v445_v38 = vshll.u32 %v4227_v17, 16  ;;  %v4248_v40 = vcombine.low %v3521_v18, %v3522_v19 }
  0x19   : > { %765 = vrot.lane.b32.xlu0 %v720_v16, %s4160_s18  ;;  %v3520_v28 = vld [vmem:[%s4203_s16 + $0x10] sm:$0xf]  ;;  %v717_v29 = vsel %vm714_vm0, %v715_v21, %v716_v22  ;;  %v2247_v31 = vrot.slane %v3948_v23, 1  ;;  %v3567_v32 = vld [vmem:[%s4203_s16 + $0xc] sm:$0xe]  ;;  %v450_v39 = vshll.u32 %v3944_v14, 16 }
  0x1a   : > { %v2246_v30 = vrot.slane %v3680_v24, 1  ;;  %v4241_v33 = vcombine.low %v3519_v27, %v3520_v28  ;;  %v3583_v34 = vld [vmem:[%s4203_s16 + $0x18] sm:$0xf]  ;;  %763 = vrot.lane.b32.xlu1 %v717_v29, %s4160_s18  ;;  %v3951_v35 = vld [vmem:[%s4203_s16 + $0x14] ss:$0 sps:$4 sm:$0x11]   ;;  %v3679_v36 = vcombine.low %v3567_v32, %v3520_v28 }
  0x1b   : > { %v4252_v42 = vld [vmem:[%s4203_s16 + $0x1c] sm:$0xf]  ;;  %v2244_v46 = vrot.slane %v3951_v35, 1  ;;  %v447_v47 = vrot.slane %v445_v38, 1  ;;  %v452_v48 = vrot.slane %v450_v39, 1  ;;  %v1979_v51 = vshll.u32 %v3951_v35, 16 }
  0x1c   : > { %v2248_v41 = vsel %vm714_vm0, %v2246_v30, %v2247_v31  ;;  %v1972_v43 = vshrl.u32 %v4241_v33, 16  ;;  %v1974_v44 = vshll.u32 %v4241_v33, 16  ;;  %v2243_v45 = vrot.slane %v3679_v36, 1  ;;  %v4260_v53 = vld [vmem:[%s4203_s16 + $0x14] ss:$0 sps:$4 sm:$0x11]  }
  0x1d   : > { %2293 = vrot.lane.b32.xlu0 %v2248_v41, %s4160_s18  ;;  %v3695_v49 = vcombine.low %v3583_v34, %v4252_v42  ;;  %v455_v52 = vshrl.u32 %v4235_v26, 16  ;;  %v448_v55 = vor.u32 %v447_v47, %v443_v37  ;;  %v457_v56 = vshll.u32 %v4235_v26, 16  ;;  %v3343_v58 = vld [vmem:[%s4203_s16 + $0x18] sm:$0xf]  ;;  %v4269_v63 = vld [vmem:[%s4203_s16 + $0x1c] sm:$0xf] }
  0x1e   : > { %v1976_v50 = vrot.slane %v1974_v44, 1  ;;  %v2245_v54 = vsel %vm714_vm0, %v2243_v45, %v2244_v46  ;;  %v462_v57 = vshll.u32 %v4215_v5, 16  ;;  %v1981_v61 = vrot.slane %v1979_v51, 1  ;;  %v4278_v9 = vld [vmem:[%s4203_s16 + $0x20] ss:$0 sps:$4 sm:$0x11]  }
  0x1f   : > { %2291 = vrot.lane.b32.xlu1 %v2245_v54, %s4160_s18  ;;  %v2486_v59 = vshll.u32 %v3695_v49, 16  ;;  %v1984_v62 = vshrl.u32 %v4248_v40, 16  ;;  %v453_v0 = vsel %vm441_vm1, %v448_v55, %v452_v48  ;;  %v459_v3 = vrot.slane %v457_v56, 1  ;;  %v3585_v15 = vld [vmem:[%s4203_s16 + $0x24] sm:$0xf]  ;;  %v4030_v31 = vld [vmem:[%s5923_s1 + $0xc] sm:$0xff]  }
  0x20   : > { %v1977_v60 = vor.u32 %v1976_v50, %v1972_v43  ;;  %v464_v4 = vrot.slane %v462_v57, 1  ;;  %v1986_v6 = vshll.u32 %v4248_v40, 16  ;;  %v1991_v5 = vshll.u32 %v3948_v23, 16  ;;  %v4284_v16 = vld [vmem:[%s4203_s16 + $0x28] sm:$0xf]  ;;  %3871 = vmatprep.subr.bf16.mxu1 %v4030_v31  ;;  %v4032_v39 = vld [vmem:[%s5923_s1] sm:$0xff]  }
  0x21   : > { %634 = vrot.lane.b32.xlu0 %v453_v0, %s4161_s19  ;;  %v960_v7 = vrot.slane %v958_v12, 1  ;;  %v963_v8 = vshll.u32 %v4260_v53, 16  ;;  %v460_v11 = vor.u32 %v459_v3, %v455_v52  ;;  %v3454_v14 = vcombine.low %v3343_v58, %v4269_v63  ;;  %v3389_v23 = vld [vmem:[%s4203_s16 + $0xc] sm:$0xe]  ;;  %v3631_v24 = vld [vmem:[%s4203_s16 + $0x18] sm:$0xe]  ;;  %3872 = vmatpush3.bf16.msra.mxu1 %v4030_v31 }
  0x22   : > { %v1982_v10 = vsel %vm441_vm1, %v1977_v60, %v1981_v61  ;;  %v1988_v13 = vrot.slane %v1986_v6, 1  ;;  %v1993_v2 = vrot.slane %v1991_v5, 1  ;;  %v2484_v21 = vshrl.u32 %v3695_v49, 16  ;;  %v4295_v30 = vld [vmem:[%s4203_s16 + $0x20] ss:$0 sps:$4 sm:$0x11]   ;;  %3835 = vmatprep.subr.bf16.mxu0 %v4032_v39 }
  0x23   : > { %2403 = vrot.lane.b32.xlu1 %v3695_v49, %s4159_s17  ;;  %v961_v12 = vor.u32 %v960_v7, %v956_v25  ;;  %v965_v18 = vrot.slane %v963_v8, 1  ;;  %v465_v19 = vsel %vm441_vm1, %v460_v11, %v464_v4  ;;  %v2488_v22 = vrot.slane %v2486_v59, 1  ;;  %v3632_v32 = vld [vmem:[%s4203_s16 + $0x24] sm:$0xe]  ;;  %v4321_v49 = vld [vmem:[%s4203_s16 + $0x1c] sm:$0xf]  ;;  %3836 = vmatpush3.bf16.msra.mxu0 %v4032_v39 }
  0x24   : > { %v1989_v20 = vor.u32 %v1988_v13, %v1984_v62  ;;  %v2491_v27 = vshll.u32 %v4278_v9, 16  ;;  %v3696_v28 = vcombine.low %v3585_v15, %v4284_v16  ;;  %v970_v25 = vshll.u32 %v3454_v14, 16  ;;  %v3523_v38 = vld [vmem:[%s4203_s16 + $0x24] sm:$0xf]  ;;  %v3390_v50 = vld [vmem:[%s4203_s16 + $0x18] sm:$0xe] }
  0x25   : > { %2163 = vrot.lane.b32.xlu0 %v1982_v10, %s4161_s19  ;;  %v3485_v34 = vcombine.low %v3389_v23, %v4207_v1  ;;  %v966_v35 = vsel %vm441_vm1, %v961_v12, %v965_v18  ;;  %v2489_v36 = vor.u32 %v2488_v22, %v2484_v21  ;;  %v3727_v41 = vcombine.low %v3631_v24, %v4252_v42  ;;  %v4311_v44 = vld [vmem:[%s4203_s16 + $0x2c] ss:$0 sps:$4 sm:$0x11]   ;;  %v4314_v1 = vld [vmem:[%s4203_s16 + $0x28] sm:$0xf] }
  0x26   : > { %v1994_v29 = vsel %vm441_vm1, %v1989_v20, %v1993_v2  ;;  %v2493_v37 = vrot.slane %v2491_v27, 1  ;;  %v2498_v43 = vshll.u32 %v3696_v28, 16  ;;  %v968_v45 = vshrl.u32 %v3454_v14, 16  ;;  %v188_v42 = vld [vmem:[%s4203_s16 + $0x18] sm:$0xf] }
  0x27   : > { %636 = vrot.lane.b32.xlu1 %v465_v19, %s4161_s19  ;;  %v972_v46 = vrot.slane %v970_v25, 1  ;;  %v975_v47 = vshll.u32 %v4295_v30, 16  ;;  %v3728_v48 = vcombine.low %v3632_v32, %v4284_v16  ;;  %v1227_v52 = vrot.slane %v3485_v34, 1  ;;  %v190_v3 = vld [vmem:[%s4203_s16 + $0x24] sm:$0xf] }
  0x28   : > { %v2494_v51 = vsel %vm441_vm1, %v2489_v36, %v2493_v37  ;;  %v1228_v54 = vrot.slane %v4260_v53, 1  ;;  %v4327_v55 = vcombine.low %v3523_v38, %v4314_v1  ;;  %v2755_v56 = vrot.slane %v3727_v41, 1  ;;  %v4339_v4 = vld [vmem:[%s4203_s16 + $0x28] sm:$0xf]  ;;  %v3525_v12 = vld [vmem:[%s4203_s16 + $0x30] sm:$0xf] }
  0x29   : > { %2165 = vrot.lane.b32.xlu0 %v1994_v29, %s4161_s19  ;;  %v2496_v57 = vshrl.u32 %v3696_v28, 16  ;;  %v2500_v58 = vrot.slane %v2498_v43, 1  ;;  %v2503_v59 = vshll.u32 %v4311_v44, 16  ;;  %v973_v60 = vor.u32 %v972_v46, %v968_v45  ;;  %v4343_v5 = vld [vmem:[%s4203_s16 + $0x2c] ss:$0 sps:$4 sm:$0x11]  }
  0x2a   : > { %v977_v61 = vrot.slane %v975_v47, 1  ;;  %v2756_v62 = vrot.slane %v4278_v9, 1  ;;  %v4333_v0 = vcombine.low %v188_v42, %v4321_v49  ;;  %v3486_v53 = vcombine.low %v3390_v50, %v4269_v63  ;;  %v3966_v10 = vld [vmem:[%s4203_s16 + $0x20] ss:$0 sps:$4 sm:$0x11]  }
  0x2b   : > { %1147 = vrot.lane.b32.xlu1 %v966_v35, %s4162_s24  ;;  %v1229_v6 = vsel %vm714_vm0, %v1227_v52, %v1228_v54  ;;  %v1998_v7 = vshll.u32 %v4327_v55, 16  ;;  %v2501_v8 = vor.u32 %v2500_v58, %v2496_v57  ;;  %v2505_v9 = vrot.slane %v2503_v59, 1  ;;  %v4358_v18 = vld [vmem:[%s4203_s16 + $0x34] sm:$0xf]  ;;  %v234_v27 = vld [vmem:[%s4203_s16 + $0x18] sm:$0xe] }
  0x2c   : > { %v978_v63 = vsel %vm441_vm1, %v973_v60, %v977_v61  ;;  %v2758_v11 = vrot.slane %v3728_v48, 1  ;;  %v469_v13 = vshll.u32 %v4333_v0, 16  ;;  %v2757_v15 = vsel %vm714_vm0, %v2755_v56, %v2756_v62  ;;  %v3569_v41 = vld [vmem:[%s4203_s16 + $0x24] sm:$0xe]  ;;  %v4391_v52 = vld [vmem:[%s4203_s16 + $0x28] sm:$0xf] }
  0x2d   : > { %877 = vrot.lane.b32.xlu0 %v3454_v14, %s4159_s17  ;;  %v4351_v14 = vcombine.low %v190_v3, %v4339_v4  ;;  %v2759_v16 = vrot.slane %v4311_v44, 1  ;;  %v1230_v2 = vrot.slane %v3486_v53, 1  ;;  %v1231_v19 = vrot.slane %v4295_v30, 1  ;;  %v4383_v46 = vld [vmem:[%s4203_s16 + $0x38] ss:$0 sps:$4 sm:$0x11]  }
  0x2e   : > { %v1996_v20 = vshrl.u32 %v4327_v55, 16  ;;  %v2000_v21 = vrot.slane %v1998_v7, 1  ;;  %v2003_v22 = vshll.u32 %v4343_v5, 16  ;;  %v2506_v23 = vsel %vm441_vm1, %v2501_v8, %v2505_v9  ;;  %v235_v57 = vld [vmem:[%s4203_s16 + $0x24] sm:$0xe] }
  0x2f   : > { %2675 = vrot.lane.b32.xlu1 %v2494_v51, %s4162_s24  ;;  %v474_v24 = vshll.u32 %v3966_v10, 16  ;;  %v467_v29 = vshrl.u32 %v4333_v0, 16  ;;  %v471_v25 = vrot.slane %v469_v13, 1  ;;  %v481_v30 = vshll.u32 %v4351_v14, 16  ;;  %v3345_v51 = vld [vmem:[%s4203_s16 + $0x24] sm:$0xf] }
  0x30   : > { %v4372_v31 = vcombine.low %v3525_v12, %v4358_v18  ;;  %v2760_v32 = vsel %vm714_vm0, %v2758_v11, %v2759_v16  ;;  %v2001_v34 = vor.u32 %v2000_v21, %v1996_v20  ;;  %v2005_v35 = vrot.slane %v2003_v22, 1  ;;  %v3587_v62 = vld [vmem:[%s4203_s16 + $0x30] sm:$0xf]  ;;  %v4402_v53 = vld [vmem:[%s4203_s16 + $0x34] sm:$0xf] }
  0x31   : > { %2405 = vrot.lane.b32.xlu0 %v3696_v28, %s4159_s17  ;;  %v4367_v28 = vld [vmem:[%s4203_s16 + $0x2c] ss:$0 sps:$4 sm:$0x11]   ;;  %v3439_v36 = vcombine.low %v234_v27, %v4321_v49  ;;  %v1232_v37 = vsel %vm714_vm0, %v1230_v2, %v1231_v19  ;;  %v476_v38 = vrot.slane %v474_v24, 1  ;;  %v472_v43 = vor.u32 %v471_v25, %v467_v29  ;;  %v4423_v24 = vld [vmem:[%s4203_s16 + $0x34] sm:$0xf] }
  0x32   : > { %v486_v39 = vshll.u32 %v4367_v28, 16  ;;  %v479_v44 = vshrl.u32 %v4351_v14, 16  ;;  %v483_v45 = vrot.slane %v481_v30, 1  ;;  %v2010_v47 = vshll.u32 %v4372_v31, 16 }
  0x33   : > { %1275 = vrot.lane.b32.xlu1 %v1229_v6, %s4163_s25  ;;  %v2006_v48 = vsel %vm441_vm1, %v2001_v34, %v2005_v35  ;;  %v721_v42 = vrot.slane %v3439_v36, 1  ;;  %v722_v49 = vrot.slane %v3966_v10, 1  ;;  %v3681_v50 = vcombine.low %v3569_v41, %v4314_v1  ;;  %v4427_v29 = vld [vmem:[%s4203_s16 + $0x38] ss:$0 sps:$4 sm:$0x11]  }
  0x34   : > { %v488_v54 = vrot.slane %v486_v39, 1  ;;  %v2008_v56 = vshrl.u32 %v4372_v31, 16  ;;  %v477_v58 = vsel %vm441_vm1, %v472_v43, %v476_v38  ;;  %v484_v59 = vor.u32 %v483_v45, %v479_v44  ;;  %v3590_v34 = vld [vmem:[%s4203_s16 + $0x40] sm:$0xf]  ;;  %v3391_v35 = vld [vmem:[%s4203_s16 + $0x24] sm:$0xe] }
  0x35   : > { %1149 = vrot.lane.b32.xlu0 %v978_v63, %s4162_s24  ;;  %v2012_v60 = vrot.slane %v2010_v47, 1  ;;  %v2015_v61 = vshll.u32 %v4383_v46, 16  ;;  %v3455_v1 = vcombine.low %v3345_v51, %v4391_v52  ;;  %v723_v3 = vsel %vm714_vm0, %v721_v42, %v722_v49  ;;  %v3633_v43 = vld [vmem:[%s4203_s16 + $0x30] sm:$0xe]  ;;  %v3634_v42 = vld [vmem:[%s4203_s16 + $0x3c] sm:$0xe] }
  0x36   : > { %v2249_v6 = vrot.slane %v3681_v50, 1  ;;  %v2250_v7 = vrot.slane %v4343_v5, 1  ;;  %v3440_v8 = vcombine.low %v235_v57, %v4339_v4  ;;  %v489_v9 = vsel %vm441_vm1, %v484_v59, %v488_v54  ;;  %v4414_v5 = vld [vmem:[%s4203_s16 + $0x2c] ss:$0 sps:$4 sm:$0x11]  }
  0x37   : > { %2803 = vrot.lane.b32.xlu1 %v2757_v15, %s4163_s25  ;;  %v2013_v10 = vor.u32 %v2012_v60, %v2008_v56  ;;  %v2017_v63 = vrot.slane %v2015_v61, 1  ;;  %v3697_v11 = vcombine.low %v3587_v62, %v4402_v53  ;;  %v982_v13 = vshll.u32 %v3455_v1, 16  ;;  %v3570_v15 = vld [vmem:[%s4203_s16 + $0x30] sm:$0xe]  ;;  %v3527_v57 = vld [vmem:[%s4203_s16 + $0x3c] sm:$0xf] }
  0x38   : > { %v2251_v16 = vsel %vm714_vm0, %v2249_v6, %v2250_v7  ;;  %v725_v4 = vrot.slane %v4367_v28, 1  ;;  %v724_v12 = vrot.slane %v3440_v8, 1  ;;  %v3682_v20 = vcombine.low %v3570_v15, %v4358_v18  ;;  %v4441_v45 = vld [vmem:[%s4203_s16 + $0x38] ss:$0 sps:$4 sm:$0x11]  }
  0x39   : > { %2677 = vrot.lane.b32.xlu0 %v2506_v23, %s4162_s24  ;;  %v2018_v2 = vsel %vm441_vm1, %v2013_v10, %v2017_v63  ;;  %v2510_v19 = vshll.u32 %v3697_v11, 16  ;;  %v980_v21 = vshrl.u32 %v3455_v1, 16  ;;  %v984_v22 = vrot.slane %v982_v13, 1  ;;  %v3347_v23 = vld [vmem:[%s4203_s16 + $0x30] sm:$0xf] }
  0x3a   : > { %v987_v27 = vshll.u32 %v4414_v5, 16  ;;  %v726_v28 = vsel %vm714_vm0, %v724_v12, %v725_v4  ;;  %v2252_v25 = vrot.slane %v3682_v20, 1  ;;  %v2253_v18 = vrot.slane %v4383_v46, 1  ;;  %v4450_v56 = vld [vmem:[%s4203_s16 + $0x44] ss:$0 sps:$4 sm:$0x11]  }
  0x3b   : > { %2805 = vrot.lane.b32.xlu1 %v2760_v32, %s4163_s25  ;;  %v3456_v30 = vcombine.low %v3347_v23, %v4423_v24  ;;  %v3589_v32 = vld [vmem:[%s4203_s16 + $0x3c] sm:$0xf]  ;;  %v985_v36 = vor.u32 %v984_v22, %v980_v21  ;;  %v2508_v38 = vshrl.u32 %v3697_v11, 16  ;;  %v2512_v39 = vrot.slane %v2510_v19, 1  ;;  %v4460_v62 = vld [vmem:[%s4203_s16 + $0x34] sm:$0xf] }
  0x3c   : > { %v2515_v41 = vshll.u32 %v4427_v29, 16  ;;  %v3698_v44 = vcombine.low %v3589_v32, %v3590_v34  ;;  %v2254_v46 = vsel %vm714_vm0, %v2252_v25, %v2253_v18  ;;  %v3729_v49 = vcombine.low %v3633_v43, %v4402_v53  ;;  %v3392_v63 = vld [vmem:[%s4203_s16 + $0x30] sm:$0xe]  ;;  %v194_v12 = vld [vmem:[%s4203_s16 + $0x3c] sm:$0xf] }
  0x3d   : > { %1277 = vrot.lane.b32.xlu0 %v1232_v37, %s4163_s25  ;;  %v989_v37 = vrot.slane %v987_v27, 1  ;;  %v994_v47 = vshll.u32 %v3456_v30, 16  ;;  %v2513_v51 = vor.u32 %v2512_v39, %v2508_v38  ;;  %v999_v59 = vshll.u32 %v4441_v45, 16  ;;  %v4481_v19 = vld [vmem:[%s4203_s16 + $0x40] sm:$0xf] }
  0x3e   : > { %v2517_v54 = vrot.slane %v2515_v41, 1  ;;  %v992_v60 = vshrl.u32 %v3456_v30, 16  ;;  %v3730_v53 = vcombine.low %v3634_v42, %v3590_v34  ;;  %v1234_v6 = vrot.slane %v4414_v5, 1  ;;  %v3990_v22 = vld [vmem:[%s4203_s16 + $0x38] ss:$0 sps:$4 sm:$0x11]  }
  0x3f   : > { %2167 = vrot.lane.b32.xlu1 %v2006_v48, %s4161_s19  ;;  %v3487_v48 = vcombine.low %v3391_v35, %v4391_v52  ;;  %v990_v50 = vsel %vm441_vm1, %v985_v36, %v989_v37  ;;  %v4456_v52 = vld [vmem:[%s4203_s16 + $0x40] sm:$0xf]  ;;  %v996_v61 = vrot.slane %v994_v47, 1  ;;  %v2761_v8 = vrot.slane %v3729_v49, 1  ;;  %v3529_v34 = vld [vmem:[%s4203_s16 + $0x48] sm:$0xf] }
  0x40   : > { %v2518_v7 = vsel %vm441_vm1, %v2513_v51, %v2517_v54  ;;  %v4467_v10 = vcombine.low %v3527_v57, %v4456_v52  ;;  %v2520_v13 = vshrl.u32 %v3698_v44, 16  ;;  %v2527_v4 = vshll.u32 %v4450_v56, 16  ;;  %v4498_v35 = vld [vmem:[%s4203_s16 + $0x4c] sm:$0xf]  ;;  %v236_v41 = vld [vmem:[%s4203_s16 + $0x30] sm:$0xe] }
  0x41   : > { %638 = vrot.lane.b32.xlu0 %v477_v58, %s4161_s19  ;;  %v2522_v58 = vshll.u32 %v3698_v44, 16  ;;  %v997_v5 = vor.u32 %v996_v61, %v992_v60  ;;  %v3488_v23 = vcombine.low %v3392_v63, %v4423_v24  ;;  %v2764_v27 = vrot.slane %v3730_v53, 1  ;;  %v4506_v47 = vld [vmem:[%s4203_s16 + $0x44] ss:$0 sps:$4 sm:$0x11]  }
  0x42   : > { %v2022_v21 = vshll.u32 %v4467_v10, 16  ;;  %v4492_v32 = vcombine.low %v194_v12, %v4481_v19  ;;  %v2020_v36 = vshrl.u32 %v4467_v10, 16  ;;  %v498_v39 = vshll.u32 %v3990_v22, 16  ;;  %v3571_v60 = vld [vmem:[%s4203_s16 + $0x3c] sm:$0xe] }
  0x43   : > { %767 = vrot.lane.b32.xlu1 %v723_v3, %s4160_s18  ;;  %v1233_v3 = vrot.slane %v3487_v48, 1  ;;  %v2524_v15 = vrot.slane %v2522_v58, 1  ;;  %v1236_v43 = vrot.slane %v3488_v23, 1  ;;  %v1237_v42 = vrot.slane %v4441_v45, 1  ;;  %v3349_v63 = vld [vmem:[%s4203_s16 + $0x3c] sm:$0xf] }
  0x44   : > { %v2024_v37 = vrot.slane %v2022_v21, 1  ;;  %v505_v49 = vshll.u32 %v4492_v32, 16  ;;  %v500_v57 = vrot.slane %v498_v39, 1  ;;  %v3441_v58 = vcombine.low %v236_v41, %v4460_v62  ;;  %v4521_v61 = vld [vmem:[%s4203_s16 + $0x50] ss:$0 sps:$4 sm:$0x11]  }
  0x45   : > { %640 = vrot.lane.b32.xlu0 %v489_v9, %s4161_s19  ;;  %v2762_v9 = vrot.slane %v4427_v29, 1  ;;  %v1235_v20 = vsel %vm714_vm0, %v1233_v3, %v1234_v6  ;;  %v2765_v29 = vrot.slane %v4450_v56, 1  ;;  %v2525_v18 = vor.u32 %v2524_v15, %v2520_v13  ;;  %v237_v21 = vld [vmem:[%s4203_s16 + $0x3c] sm:$0xe]  ;;  %v3351_v39 = vld [vmem:[%s4203_s16 + $0x48] sm:$0xf] }
  0x46   : > { %v2025_v54 = vor.u32 %v2024_v37, %v2020_v36  ;;  %v510_v45 = vshll.u32 %v4506_v47, 16  ;;  %v503_v53 = vshrl.u32 %v4492_v32, 16  ;;  %v507_v3 = vrot.slane %v505_v49, 1  ;;  %v3572_v36 = vld [vmem:[%s4203_s16 + $0x48] sm:$0xe] }
  0x47   : > { %2295 = vrot.lane.b32.xlu1 %v2251_v16, %s4160_s18  ;;  %v2763_v24 = vsel %vm714_vm0, %v2761_v8, %v2762_v9  ;;  %v2766_v51 = vsel %vm714_vm0, %v2764_v27, %v2765_v29  ;;  %v728_v8 = vrot.slane %v3990_v22, 1  ;;  %v3683_v9 = vcombine.low %v3571_v60, %v4456_v52  ;;  %v3591_v29 = vld [vmem:[%s4203_s16 + $0x48] sm:$0xf]  ;;  %v4559_v41 = vld [vmem:[%s4203_s16 + $0x4c] sm:$0xf] }
  0x48   : > { %v512_v15 = vrot.slane %v510_v45, 1  ;;  %v4566_v49 = vld [vmem:[%s4203_s16 + $0x50] ss:$0 sps:$4 sm:$0x11]   ;;  %v4035_v45 = vld [vmem:[%s5923_s1 + $0x14] ss:$0 sps:$4 sm:$0xff]  }
  0x49   : > { %2169 = vrot.lane.b32.xlu0 %v2018_v2, %s4161_s19  ;;  %v4476_v2 = vld [vmem:[%s4203_s16 + $0x44] ss:$0 sps:$4 sm:$0x11]   ;;  %v2255_v23 = vrot.slane %v3683_v9, 1  ;;  %v4036_v60 = vld [vmem:[%s5923_s1 + $0x8] ss:$0 sps:$4 sm:$0xff]   ;;  %3908 = vmatprep.subr.msk.bf16.mxu1 %vm1517_vm2, %v4035_v45 }
  0x4a   : > { %v2027_v38 = vshll.u32 %v4476_v2, 16  ;;  %v2256_v27 = vrot.slane %v4476_v2, 1  ;;  %v3041_v9 = vsel %vm1517_vm2, %v4035_v45, 0  ;;  %3907 = vmatprep.subr.msk.bf16.mxu0 %vm1517_vm2, %v4036_v60  ;;  %v4637_v45 = vld [vmem:[%s4203_s16 + $0x50] ss:$0 sps:$4 sm:$0x11]  }
  0x4b   : > { %879 = vrot.lane.b32.xlu1 %v3455_v1, %s4159_s17  ;;  %v192_v1 = vld [vmem:[%s4203_s16 + $0x30] sm:$0xf]  ;;  %3874 = vmatpush3.bf16.msra.mxu1 %v3041_v9 }
  0x4c   : > { %v4472_v16 = vcombine.low %v192_v1, %v4460_v62  ;;  %v2029_v56 = vrot.slane %v2027_v38, 1  ;;  %v1238_v1 = vsel %vm714_vm0, %v1236_v43, %v1237_v42  ;;  %v2257_v37 = vsel %vm714_vm0, %v2255_v23, %v2256_v27  ;;  %v4554_v38 = vld [vmem:[%s4203_s16 + $0x44] ss:$0 sps:$4 sm:$0x11]   ;;  %v3531_v27 = vld [vmem:[%s4203_s16 + $0x54] sm:$0xf] }
  0x4d   : > { %769 = vrot.lane.b32.xlu0 %v726_v28, %s4160_s18 }
  0x4e   : > { %v493_v28 = vshll.u32 %v4472_v16, 16  ;;  %v2030_v62 = vsel %vm441_vm1, %v2025_v54, %v2029_v56  ;;  %v1011_v54 = vshll.u32 %v4554_v38, 16  ;;  %v3458_v56 = vcombine.low %v3351_v39, %v4559_v41 }
  0x4f   : > { %2407 = vrot.lane.b32.xlu1 %v3697_v11, %s4159_s17  ;;  %v1001_v11 = vrot.slane %v999_v59, 1 }
  0x51   : > { %2297 = vrot.lane.b32.xlu0 %v2254_v46, %s4160_s18  ;;  %v1002_v25 = vsel %vm441_vm1, %v997_v5, %v1001_v11  ;;  %v495_v46 = vrot.slane %v493_v28, 1  ;;  %v4531_v11 = vld [vmem:[%s4203_s16 + $0x40] sm:$0xf]  ;;  %v508_v5 = vor.u32 %v507_v3, %v503_v53  ;;  %v4545_v28 = vld [vmem:[%s4203_s16 + $0x4c] sm:$0xf]  ;;  %v2539_v3 = vshll.u32 %v4566_v49, 16 }
  0x52   : > { %v3457_v52 = vcombine.low %v3349_v63, %v4531_v11  ;;  %v3699_v2 = vcombine.low %v3591_v29, %v4545_v28  ;;  %v4592_v63 = vld [vmem:[%s4203_s16 + $0x50] ss:$0 sps:$4 sm:$0x11]  }
  0x53   : > { %1151 = vrot.lane.b32.xlu1 %v990_v50, %s4162_s24  ;;  %v4512_v50 = vcombine.low %v3529_v34, %v4498_v35  ;;  %v1023_v29 = vshll.u32 %v4592_v63, 16 }
  0x54   : > { %v1006_v34 = vshll.u32 %v3457_v52, 16  ;;  %v2532_v53 = vshrl.u32 %v3699_v2, 16 }
  0x55   : > { %881 = vrot.lane.b32.xlu0 %v3456_v30, %s4159_s17  ;;  %v2529_v30 = vrot.slane %v2527_v4, 1  ;;  %v2034_v6 = vshll.u32 %v4512_v50, 16  ;;  %v2032_v4 = vshrl.u32 %v4512_v50, 16 }
  0x56   : > { %v1008_v42 = vrot.slane %v1006_v34, 1 }
  0x57   : > { %2679 = vrot.lane.b32.xlu1 %v2518_v7, %s4162_s24  ;;  %v2530_v48 = vsel %vm441_vm1, %v2525_v18, %v2529_v30  ;;  %v727_v7 = vrot.slane %v3441_v58, 1  ;;  %v2036_v12 = vrot.slane %v2034_v6, 1  ;;  %v4572_v58 = vld [vmem:[%s4203_s16 + $0x58] sm:$0xf]  ;;  %v3393_v6 = vld [vmem:[%s4203_s16 + $0x3c] sm:$0xe] }
  0x59   : > { %2409 = vrot.lane.b32.xlu0 %v3698_v44, %s4159_s17  ;;  %v491_v44 = vshrl.u32 %v4472_v16, 16  ;;  %v729_v22 = vsel %vm714_vm0, %v727_v7, %v728_v8  ;;  %v2037_v18 = vor.u32 %v2036_v12, %v2032_v4  ;;  %v1018_v7 = vshll.u32 %v3458_v56, 16  ;;  %v3635_v4 = vld [vmem:[%s4203_s16 + $0x48] sm:$0xe] }
  0x5a   : > { %v2541_v12 = vrot.slane %v2539_v3, 1 }
  0x5b   : > { %1279 = vrot.lane.b32.xlu1 %v1235_v20, %s4163_s25  ;;  %v496_v59 = vor.u32 %v495_v46, %v491_v44  ;;  %v2039_v20 = vshll.u32 %v4521_v61, 16  ;;  %v731_v44 = vrot.slane %v4506_v47, 1  ;;  %v3684_v46 = vcombine.low %v3572_v36, %v4498_v35  ;;  %v3636_v36 = vld [vmem:[%s4203_s16 + $0x54] sm:$0xe] }
  0x5c   : > { %v2259_v47 = vrot.slane %v4521_v61, 1  ;;  %v1020_v23 = vrot.slane %v1018_v7, 1 }
  0x5d   : > { %1153 = vrot.lane.b32.xlu0 %v1002_v25, %s4162_s24  ;;  %v501_v13 = vsel %vm441_vm1, %v496_v59, %v500_v57  ;;  %v513_v25 = vsel %vm441_vm1, %v508_v5, %v512_v15  ;;  %v2041_v30 = vrot.slane %v2039_v20, 1  ;;  %v3593_v57 = vld [vmem:[%s4203_s16 + $0x54] sm:$0xf]  ;;  %v2258_v59 = vrot.slane %v3684_v46, 1 }
  0x5e   : > { %v3700_v61 = vcombine.low %v3593_v57, %v4572_v58  ;;  %v3489_v5 = vcombine.low %v3393_v6, %v4531_v11  ;;  %v196_v11 = vld [vmem:[%s4203_s16 + $0x48] sm:$0xf] }
  0x5f   : > { %2807 = vrot.lane.b32.xlu1 %v2763_v24, %s4163_s25  ;;  %v3442_v24 = vcombine.low %v237_v21, %v4481_v19  ;;  %v2042_v19 = vsel %vm441_vm1, %v2037_v18, %v2041_v30  ;;  %v2260_v15 = vsel %vm714_vm0, %v2258_v59, %v2259_v47  ;;  %v4605_v18 = vld [vmem:[%s4203_s16 + $0x58] sm:$0xf]  ;;  %v4609_v30 = vld [vmem:[%s4203_s16 + $0x4c] sm:$0xf]  ;;  %v2768_v47 = vrot.slane %v4566_v49, 1 }
  0x60   : > { %v2546_v20 = vshll.u32 %v3700_v61, 16  ;;  %v4617_v39 = vcombine.low %v3531_v27, %v4605_v18  ;;  %v1243_v27 = vrot.slane %v4592_v63, 1 }
  0x61   : > { %2681 = vrot.lane.b32.xlu0 %v2530_v48, %s4162_s24  ;;  %v730_v43 = vrot.slane %v3442_v24, 1  ;;  %v1004_v48 = vshrl.u32 %v3457_v52, 16  ;;  %v3731_v24 = vcombine.low %v3635_v4, %v4545_v28  ;;  %v4622_v28 = vcombine.low %v196_v11, %v4609_v30 }
  0x62   : > { %v2046_v59 = vshll.u32 %v4617_v39, 16  ;;  %v2044_v9 = vshrl.u32 %v4617_v39, 16 }
  0x63   : > { %2809 = vrot.lane.b32.xlu1 %v2766_v51, %s4163_s25  ;;  %v2534_v51 = vshll.u32 %v3699_v2, 16  ;;  %v732_v35 = vsel %vm714_vm0, %v730_v43, %v731_v44  ;;  %v2544_v43 = vshrl.u32 %v3700_v61, 16  ;;  %v2548_v44 = vrot.slane %v2546_v20, 1  ;;  %v4659_v20 = vld [vmem:[%s4203_s16 + $0x5c] ss:$0 sps:$4 sm:$0x11]  }
  0x64   : > { %v2767_v57 = vrot.slane %v3731_v24, 1  ;;  %v515_v4 = vshrl.u32 %v4622_v28, 16 }
  0x65   : > { %1281 = vrot.lane.b32.xlu0 %v1238_v1, %s4163_s25  ;;  %v1009_v1 = vor.u32 %v1008_v42, %v1004_v48  ;;  %v2536_v8 = vrot.slane %v2534_v51, 1  ;;  %v1025_v48 = vrot.slane %v1023_v29, 1  ;;  %v198_v51 = vld [vmem:[%s4203_s16 + $0x54] sm:$0xf] }
  0x66   : > { %v2769_v6 = vsel %vm714_vm0, %v2767_v57, %v2768_v47  ;;  %v734_v57 = vrot.slane %v4637_v45, 1 }
  0x67   : > { %2171 = vrot.lane.b32.xlu1 %v2030_v62, %s4161_s19  ;;  %v1013_v62 = vrot.slane %v1011_v54, 1  ;;  %v2537_v21 = vor.u32 %v2536_v8, %v2532_v53  ;;  %v4626_v54 = vld [vmem:[%s4203_s16 + $0x58] sm:$0xf]  ;;  %v2549_v53 = vor.u32 %v2548_v44, %v2544_v43  ;;  %v4650_v8 = vld [vmem:[%s4203_s16 + $0x64] sm:$0xf]  ;;  %v534_v43 = vshll.u32 %v4659_v20, 16 }
  0x68   : > { %v3573_v44 = vld [vmem:[%s4203_s16 + $0x54] sm:$0xe] }
  0x69   : > { %642 = vrot.lane.b32.xlu0 %v501_v13, %s4161_s19  ;;  %v1519_v13 = vsel %vm1517_vm2, %v4036_v60, 0  ;;  %v2542_v34 = vsel %vm441_vm1, %v2537_v21, %v2541_v12  ;;  %v517_v60 = vshll.u32 %v4622_v28, 16  ;;  %v3685_v47 = vcombine.low %v3573_v44, %v4605_v18  ;;  %v3595_v18 = vld [vmem:[%s4203_s16 + $0x60] sm:$0xf] }
  0x6a   : > { %3838 = vmatpush3.bf16.msra.mxu0 %v1519_v13  ;;  %v2048_v13 = vrot.slane %v2046_v59, 1  ;;  %v4731_v44 = vld [vmem:[%s4203_s16 + $0x68] ss:$0 sps:$4 sm:$0x11]  }
  0x6b   : > { %771 = vrot.lane.b32.xlu1 %v729_v22, %s4160_s18  ;;  %v1016_v22 = vshrl.u32 %v3458_v56, 16  ;;  %v519_v12 = vrot.slane %v517_v60, 1  ;;  %v536_v60 = vrot.slane %v534_v43, 1 }
  0x6c   : > { %v2049_v11 = vor.u32 %v2048_v13, %v2044_v9  ;;  %v2261_v9 = vrot.slane %v3685_v47, 1 }
  0x6d   : > { %644 = vrot.lane.b32.xlu0 %v513_v25, %s4161_s19  ;;  %v4010_v25 = vld [vmem:[%s4203_s16 + $0x5c] ss:$0 sps:$4 sm:$0x11]   ;;  %v1021_v46 = vor.u32 %v1020_v23, %v1016_v22 }
  0x6e   : > { %v2551_v42 = vshll.u32 %v4010_v25, 16  ;;  %v2771_v7 = vrot.slane %v4010_v25, 1 }
  0x6f   : > { %2299 = vrot.lane.b32.xlu1 %v2257_v37, %s4160_s18  ;;  %v1239_v37 = vrot.slane %v3489_v5, 1  ;;  %v238_v5 = vld [vmem:[%s4203_s16 + $0x48] sm:$0xe] }
  0x70   : > { %v2553_v3 = vrot.slane %v2551_v42, 1 }
  0x71   : > { %2173 = vrot.lane.b32.xlu0 %v2042_v19, %s4161_s19  ;;  %v3394_v19 = vld [vmem:[%s4203_s16 + $0x48] sm:$0xe] }
  0x72   : > { %v3490_v49 = vcombine.low %v3394_v19, %v4559_v41  ;;  %v522_v41 = vshll.u32 %v4637_v45, 16  ;;  %v2554_v22 = vsel %vm441_vm1, %v2549_v53, %v2553_v3  ;;  %v239_v45 = vld [vmem:[%s4203_s16 + $0x54] sm:$0xe] }
  0x73   : > { %883 = vrot.lane.b32.xlu1 %v3457_v52, %s4159_s17  ;;  %v1014_v52 = vsel %vm441_vm1, %v1009_v1, %v1013_v62  ;;  %v1026_v1 = vsel %vm441_vm1, %v1021_v46, %v1025_v48  ;;  %v4680_v48 = vld [vmem:[%s4203_s16 + $0x68] ss:$0 sps:$4 sm:$0x11]  }
  0x74   : > { %v1242_v23 = vrot.slane %v3490_v49, 1  ;;  %v4693_v49 = vld [vmem:[%s4203_s16 + $0x58] sm:$0xf] }
  0x75   : > { %773 = vrot.lane.b32.xlu0 %v732_v35, %s4160_s18 }
  0x76   : > { %v1244_v46 = vsel %vm714_vm0, %v1242_v23, %v1243_v27  ;;  %v3574_v23 = vld [vmem:[%s4203_s16 + $0x60] sm:$0xe]  ;;  %v4717_v27 = vld [vmem:[%s4203_s16 + $0x5c] ss:$0 sps:$4 sm:$0x11]  }
  0x77   : > { %2411 = vrot.lane.b32.xlu1 %v3699_v2, %s4159_s17  ;;  %v1240_v2 = vrot.slane %v4554_v38, 1  ;;  %v3732_v38 = vcombine.low %v3636_v36, %v4572_v58  ;;  %v4642_v58 = vcombine.low %v198_v51, %v4626_v54  ;;  %v3443_v36 = vcombine.low %v238_v5, %v4609_v30 }
  0x78   : > { %v3444_v5 = vcombine.low %v239_v45, %v4626_v54 }
  0x79   : > { %2301 = vrot.lane.b32.xlu0 %v2260_v15, %s4160_s18  ;;  %v1241_v35 = vsel %vm714_vm0, %v1239_v37, %v1240_v2  ;;  %v2770_v62 = vrot.slane %v3732_v38, 1  ;;  %v520_v2 = vor.u32 %v519_v12, %v515_v4  ;;  %v527_v63 = vshrl.u32 %v4642_v58, 16 }
  0x7a   : > { %v733_v38 = vrot.slane %v3443_v36, 1  ;;  %v3686_v36 = vcombine.low %v3574_v23, %v4650_v8 }
  0x7b   : > { %1155 = vrot.lane.b32.xlu1 %v1014_v52, %s4162_s24  ;;  %v529_v52 = vshll.u32 %v4642_v58, 16  ;;  %v2772_v25 = vsel %vm714_vm0, %v2770_v62, %v2771_v7  ;;  %v2063_v62 = vshll.u32 %v4680_v48, 16  ;;  %v4703_v7 = vld [vmem:[%s4203_s16 + $0x64] sm:$0xf] }
  0x7d   : > { %885 = vrot.lane.b32.xlu0 %v3458_v56, %s4159_s17  ;;  %v4632_v56 = vld [vmem:[%s4203_s16 + $0x5c] ss:$0 sps:$4 sm:$0x11]   ;;  %v531_v19 = vrot.slane %v529_v52, 1  ;;  %v2065_v52 = vrot.slane %v2063_v62, 1  ;;  %v2563_v62 = vshll.u32 %v4731_v44, 16 }
  0x7e   : > { %v2051_v15 = vshll.u32 %v4632_v56, 16  ;;  %v2262_v13 = vrot.slane %v4632_v56, 1 }
  0x7f   : > { %2683 = vrot.lane.b32.xlu1 %v2542_v34, %s4162_s24  ;;  %v524_v34 = vrot.slane %v522_v41, 1  ;;  %v532_v53 = vor.u32 %v531_v19, %v527_v63  ;;  %v736_v63 = vrot.slane %v3444_v5, 1  ;;  %v737_v19 = vrot.slane %v4659_v20, 1 }
  0x80   : > { %v2053_v24 = vrot.slane %v2051_v15, 1  ;;  %v2264_v20 = vrot.slane %v3686_v36, 1  ;;  %v3638_v36 = vld [vmem:[%s4203_s16 + $0x6c] sm:$0xe] }
  0x81   : > { %2413 = vrot.lane.b32.xlu0 %v3700_v61, %s4159_s17  ;;  %v3533_v61 = vld [vmem:[%s4203_s16 + $0x60] sm:$0xf]  ;;  %v525_v59 = vsel %vm441_vm1, %v520_v2, %v524_v34  ;;  %v537_v4 = vsel %vm441_vm1, %v532_v53, %v536_v60  ;;  %v4722_v34 = vld [vmem:[%s4203_s16 + $0x64] sm:$0xf]  ;;  %v4745_v60 = vld [vmem:[%s4203_s16 + $0x70] sm:$0xf]  ;;  %v738_v53 = vsel %vm714_vm0, %v736_v63, %v737_v19 }
  0x82   : > { %v4667_v29 = vcombine.low %v3533_v61, %v4650_v8  ;;  %v2054_v51 = vsel %vm441_vm1, %v2049_v11, %v2053_v24  ;;  %v735_v61 = vsel %vm714_vm0, %v733_v38, %v734_v57  ;;  %v3355_v24 = vld [vmem:[%s4203_s16 + $0x60] sm:$0xf]  ;;  %v1035_v8 = vshll.u32 %v4717_v27, 16 }
  0x83   : > { %1283 = vrot.lane.b32.xlu1 %v1241_v35, %s4163_s25  ;;  %v3353_v35 = vld [vmem:[%s4203_s16 + $0x54] sm:$0xf] }
  0x84   : > { %v2058_v42 = vshll.u32 %v4667_v29, 16  ;;  %v2056_v3 = vshrl.u32 %v4667_v29, 16  ;;  %v3459_v15 = vcombine.low %v3353_v35, %v4693_v49  ;;  %v2265_v35 = vrot.slane %v4680_v48, 1 }
  0x85   : > { %1157 = vrot.lane.b32.xlu0 %v1026_v1, %s4162_s24 }
  0x86   : > { %v1030_v11 = vshll.u32 %v3459_v15, 16  ;;  %v1028_v38 = vshrl.u32 %v3459_v15, 16 }
  0x87   : > { %v4662_v21 = vpop.permute.xlu1 %875  ;;  %2811 = vrot.lane.b32.xlu1 %v2769_v6, %s4163_s25  ;;  %v2060_v6 = vrot.slane %v2058_v42, 1  ;;  %v3395_v42 = vld [vmem:[%s4203_s16 + $0x54] sm:$0xe] }
  0x88   : > { %v1032_v57 = vrot.slane %v1030_v11, 1  ;;  %v3491_v48 = vcombine.low %v3395_v42, %v4693_v49  ;;  %v3535_v42 = vld [vmem:[%s4203_s16 + $0x6c] sm:$0xf] }
  0x89   : > { %2685 = vrot.lane.b32.xlu0 %v2554_v22, %s4162_s24  ;;  %v2061_v12 = vor.u32 %v2060_v6, %v2056_v3  ;;  %v3701_v22 = vcombine.low %v3595_v18, %v4703_v7 }
  0x8b   : > { %v4673_v37 = vpop.permute.xlu0 %765  ;;  %2813 = vrot.lane.b32.xlu1 %v2772_v25, %s4163_s25  ;;  %v2263_v25 = vsel %vm714_vm0, %v2261_v9, %v2262_v13  ;;  %v2066_v2 = vsel %vm441_vm1, %v2061_v12, %v2065_v52  ;;  %v2558_v43 = vshll.u32 %v3701_v22, 16  ;;  %v2556_v3 = vshrl.u32 %v3701_v22, 16  ;;  %v3396_v52 = vld [vmem:[%s4203_s16 + $0x60] sm:$0xe] }
  0x8c   : > { %v4684_v30 = vpop.permute.xlu1 %763  ;;  %v1033_v9 = vor.u32 %v1032_v57, %v1028_v38  ;;  %v1037_v13 = vrot.slane %v1035_v8, 1  ;;  %v1246_v38 = vrot.slane %v4717_v27, 1  ;;  %v4779_v57 = vld [vmem:[%s4203_s16 + $0x74] ss:$0 sps:$4 sm:$0x11]  }
  0x8d   : > { %1285 = vrot.lane.b32.xlu0 %v1244_v46, %s4163_s25  ;;  %v2560_v6 = vrot.slane %v2558_v43, 1  ;;  %v4782_v8 = vld [vmem:[%s4203_s16 + $0x70] sm:$0xf] }
  0x8e   : > { %v1038_v19 = vsel %vm441_vm1, %v1033_v9, %v1037_v13 }
  0x8f   : > { %v4695_v1 = vpop.permute.xlu0 %2293  ;;  %2175 = vrot.lane.b32.xlu1 %v2054_v51, %s4161_s19  ;;  %v4736_v51 = vcombine.low %v3355_v24, %v4722_v34  ;;  %v2561_v23 = vor.u32 %v2560_v6, %v2556_v3  ;;  %v200_v3 = vld [vmem:[%s4203_s16 + $0x60] sm:$0xf] }
  0x91   : > { %v4708_v41 = vpop.permute.xlu1 %2291  ;;  %646 = vrot.lane.b32.xlu0 %v525_v59, %s4161_s19  ;;  %v3597_v59 = vld [vmem:[%s4203_s16 + $0x6c] sm:$0xf]  ;;  %v1042_v18 = vshll.u32 %v4736_v51, 16 }
  0x92   : > { %v4754_v5 = vcombine.low %v3597_v59, %v4745_v60 }
  0x93   : > { %775 = vrot.lane.b32.xlu1 %v735_v61, %s4160_s18  ;;  %v635_v56 = vpop.permute.xlu0 %634  ;;  %v3637_v61 = vld [vmem:[%s4203_s16 + $0x60] sm:$0xe]  ;;  %v1044_v63 = vrot.slane %v1042_v18, 1  ;;  %v2774_v18 = vrot.slane %v4731_v44, 1  ;;  %v2575_v44 = vshll.u32 %v4779_v57, 16 }
  0x94   : > { %v1309_v49 = vsel %vm1307_vm3, %v4227_v17, %v635_v56  ;;  %v3733_v11 = vcombine.low %v3637_v61, %v4703_v7  ;;  %v2570_v17 = vshll.u32 %v4754_v5, 16  ;;  %v1245_v56 = vrot.slane %v3491_v48, 1 }
  0x95   : > { %v4724_v54 = vpop.permute.xlu1 %2403  ;;  %648 = vrot.lane.b32.xlu0 %v537_v4, %s4161_s19  ;;  %v4757_v4 = vld [vmem:[%s4203_s16 + $0x68] ss:$0 sps:$4 sm:$0x11]   ;;  %v1342_v7 = vsel %vm1340_vm4, %v1309_v49, %v4684_v30  ;;  %v4791_v30 = vld [vmem:[%s4203_s16 + $0x64] sm:$0xf]  ;;  %v2568_v48 = vshrl.u32 %v4754_v5, 16 }
  0x96   : > { %v1047_v43 = vshll.u32 %v4757_v4, 16 }
  0x97   : > { %2303 = vrot.lane.b32.xlu1 %v2263_v25, %s4160_s18  ;;  %v2164_v46 = vpop.permute.xlu0 %2163  ;;  %v2565_v25 = vrot.slane %v2563_v62, 1  ;;  %v2773_v62 = vrot.slane %v3733_v11, 1  ;;  %v202_v11 = vld [vmem:[%s4203_s16 + $0x6c] sm:$0xf] }
  0x99   : > { %v4739_v47 = vpop.permute.xlu1 %636  ;;  %2177 = vrot.lane.b32.xlu0 %v2066_v2, %s4161_s19  ;;  %v1040_v2 = vshrl.u32 %v4736_v51, 16  ;;  %v2566_v59 = vsel %vm441_vm1, %v2561_v23, %v2565_v25  ;;  %v1249_v25 = vrot.slane %v4757_v4, 1 }
  0x9b   : > { %887 = vrot.lane.b32.xlu1 %v3459_v15, %s4159_s17  ;;  %v2166_v45 = vpop.permute.xlu0 %2165  ;;  %v2266_v15 = vsel %vm714_vm0, %v2264_v20, %v2265_v35  ;;  %v2836_v20 = vsel %vm1307_vm3, %v4241_v33, %v2164_v46  ;;  %v3492_v35 = vcombine.low %v3396_v52, %v4722_v34  ;;  %v1045_v27 = vor.u32 %v1044_v63, %v1040_v2  ;;  %v4812_v52 = vld [vmem:[%s4203_s16 + $0x74] ss:$0 sps:$4 sm:$0x11]  }
  0x9c   : > { %v1375_v33 = vsel %vm1373_vm5, %v1342_v7, %v4662_v21  ;;  %v1049_v34 = vrot.slane %v1047_v43, 1  ;;  %v2572_v46 = vrot.slane %v2570_v17, 1  ;;  %v2868_v61 = vsel %vm1340_vm4, %v2836_v20, %v4708_v41 }
  0x9d   : > { %v1148_v12 = vpop.permute.xlu1 %1147  ;;  %777 = vrot.lane.b32.xlu0 %v738_v53, %s4160_s18  ;;  %v3734_v53 = vcombine.low %v3638_v36, %v4745_v60  ;;  %v4799_v60 = vcombine.low %v3535_v42, %v4782_v8  ;;  %v4808_v21 = vcombine.low %v200_v3, %v4791_v30  ;;  %v2838_v41 = vsel %vm1307_vm3, %v4248_v40, %v2166_v45  ;;  %v4822_v36 = vld [vmem:[%s4203_s16 + $0x70] sm:$0xf]  ;;  %v4829_v45 = vld [vmem:[%s4203_s16 + $0x68] ss:$0 sps:$4 sm:$0x11]  }
  0x9e   : > { %v1408_v9 = vsel %vm1406_vm6, %v1375_v33, %v1148_v12  ;;  %v1248_v23 = vrot.slane %v3492_v35, 1  ;;  %v2900_v2 = vsel %vm1373_vm5, %v2868_v61, %v4724_v54  ;;  %v2573_v63 = vor.u32 %v2572_v46, %v2568_v48  ;;  %v4853_v35 = vld [vmem:[%s4203_s16 + $0x7c] sm:$0xf] }
  0x9f   : > { %2415 = vrot.lane.b32.xlu1 %v3701_v22, %s4159_s17  ;;  %v4766_v24 = vpop.permute.xlu0 %877  ;;  %v2776_v49 = vrot.slane %v3734_v53, 1  ;;  %v2070_v40 = vshll.u32 %v4799_v60, 16  ;;  %v1050_v4 = vsel %vm441_vm1, %v1045_v27, %v1049_v34  ;;  %v541_v54 = vshll.u32 %v4808_v21, 16  ;;  %v240_v27 = vld [vmem:[%s4203_s16 + $0x60] sm:$0xe] }
  0xa0   : > { %v1311_v42 = vsel %vm1307_vm3, %v4235_v26, %v4739_v47  ;;  %v2870_v7 = vsel %vm1340_vm4, %v2838_v41, %v4695_v1  ;;  %v2775_v20 = vsel %vm714_vm0, %v2773_v62, %v2774_v18  ;;  %v2068_v26 = vshrl.u32 %v4799_v60, 16  ;;  %v3537_v47 = vld [vmem:[%s4203_s16 + $0x78] sm:$0xf]  ;;  %v4864_v34 = vld [vmem:[%s4203_s16 + $0x74] ss:$0 sps:$4 sm:$0x11]  }
  0xa1   : > { %v2676_v22 = vpop.permute.xlu1 %2675  ;;  %2305 = vrot.lane.b32.xlu0 %v2266_v15, %s4160_s18  ;;  %v2075_v1 = vshll.u32 %v4812_v52, 16  ;;  %v2072_v53 = vrot.slane %v2070_v40, 1  ;;  %v539_v3 = vshrl.u32 %v4808_v21, 16  ;;  %v1344_v48 = vsel %vm1340_vm4, %v1311_v42, %v4673_v37 }
  0xa2   : > { %v2932_v17 = vsel %vm1406_vm6, %v2900_v2, %v2676_v22  ;;  %v543_v18 = vrot.slane %v541_v54, 1  ;;  %v1377_v46 = vsel %vm1373_vm5, %v1344_v48, %v4766_v24  ;;  %v3575_v2 = vld [vmem:[%s4203_s16 + $0x6c] sm:$0xe]  ;;  %v4893_v54 = vld [vmem:[%s4203_s16 + $0x70] sm:$0xf] }
  0xa3   : > { %1159 = vrot.lane.b32.xlu1 %v1038_v19, %s4162_s24  ;;  %v2406_v6 = vpop.permute.xlu0 %2405  ;;  %v2777_v19 = vrot.slane %v4779_v57, 1  ;;  %v2073_v24 = vor.u32 %v2072_v53, %v2068_v26 }
  0xa5   : > { %v1276_v13 = vpop.permute.xlu1 %1275  ;;  %889 = vrot.lane.b32.xlu0 %v4736_v51, %s4159_s17  ;;  %v1247_v51 = vsel %vm714_vm0, %v1245_v56, %v1246_v38  ;;  %v2577_v56 = vrot.slane %v2575_v44, 1  ;;  %v4843_v38 = vcombine.low %v202_v11, %v4822_v36  ;;  %v3445_v11 = vcombine.low %v240_v27, %v4791_v30 }
  0xa6   : > { %v1441_v15 = vsel %vm1439_vm7, %v1408_v9, %v1276_v13  ;;  %v4871_v13 = vcombine.low %v3537_v47, %v4853_v35 }
  0xa7   : > { %2687 = vrot.lane.b32.xlu1 %v2566_v59, %s4162_s24  ;;  %3839 = vmatprep.mubr.msk.bf16.mxu0 %vm1484_vm8, %v1441_v15  ;;  %v1150_v12 = vpop.permute.xlu0 %1149  ;;  %v2578_v62 = vsel %vm441_vm1, %v2573_v63, %v2577_v56  ;;  %v553_v9 = vshll.u32 %v4843_v38, 16  ;;  %v2778_v15 = vsel %vm714_vm0, %v2776_v49, %v2777_v19  ;;  %v551_v40 = vshrl.u32 %v4843_v38, 16  ;;  %v4887_v19 = vld [vmem:[%s4203_s16 + $0x80] ss:$0 sps:$4 sm:$0x11]  }
  0xa8   : > { %v1410_v37 = vsel %vm1406_vm6, %v1377_v46, %v1150_v12  ;;  %v558_v49 = vshll.u32 %v4864_v34, 16  ;;  %v2082_v30 = vshll.u32 %v4871_v13, 16  ;;  %v3357_v56 = vld [vmem:[%s4203_s16 + $0x6c] sm:$0xf]  ;;  %v2080_v53 = vshrl.u32 %v4871_v13, 16 }
  0xa9   : > { %v2804_v43 = vpop.permute.xlu1 %2803  ;;  %2417 = vrot.lane.b32.xlu0 %v4754_v5, %s4159_s17  ;;  %v2902_v5 = vsel %vm1373_vm5, %v2870_v7, %v2406_v6  ;;  %v546_v6 = vshll.u32 %v4829_v45, 16  ;;  %v3461_v26 = vcombine.low %v3357_v56, %v4893_v54 }
  0xaa   : > { %v2964_v22 = vsel %vm1439_vm7, %v2932_v17, %v2804_v43  ;;  %v1250_v17 = vsel %vm714_vm0, %v1248_v23, %v1249_v25  ;;  %v544_v43 = vor.u32 %v543_v18, %v539_v3  ;;  %v3687_v23 = vcombine.low %v3575_v2, %v4782_v8 }
  0xab   : > { %1287 = vrot.lane.b32.xlu1 %v1247_v51, %s4163_s25  ;;  %3875 = vmatprep.mubr.msk.bf16.mxu1 %vm1484_vm8, %v2964_v22  ;;  %v2678_v57 = vpop.permute.xlu0 %2677  ;;  %v2077_v51 = vrot.slane %v2075_v1, 1  ;;  %v548_v12 = vrot.slane %v546_v6, 1  ;;  %v739_v22 = vrot.slane %v3445_v11, 1  ;;  %v241_v1 = vld [vmem:[%s4203_s16 + $0x6c] sm:$0xe]  ;;  %v2084_v3 = vrot.slane %v2082_v30, 1 }
  0xac   : > { %v2934_v59 = vsel %vm1406_vm6, %v2902_v5, %v2678_v57  ;;  %v740_v5 = vrot.slane %v4829_v45, 1  ;;  %v560_v57 = vrot.slane %v558_v49, 1  ;;  %v3599_v45 = vld [vmem:[%s4203_s16 + $0x78] sm:$0xf]  ;;  %v4911_v6 = vld [vmem:[%s4203_s16 + $0x7c] sm:$0xf]  ;;  %v3446_v46 = vcombine.low %v241_v1, %v4822_v36 }
  0xad   : > { %v2806_v33 = vpop.permute.xlu1 %2805  ;;  %1161 = vrot.lane.b32.xlu0 %v1050_v4, %s4162_s24  ;;  %v555_v4 = vrot.slane %v553_v9, 1  ;;  %v2078_v7 = vsel %vm441_vm1, %v2073_v24, %v2077_v51  ;;  %v549_v47 = vsel %vm441_vm1, %v544_v43, %v548_v12  ;;  %v2267_v48 = vrot.slane %v3687_v23, 1  ;;  %v3397_v11 = vld [vmem:[%s4203_s16 + $0x6c] sm:$0xe]  ;;  %v3360_v30 = vld [vmem:[%s4203_s16 + $0x7c] sm:$0xf] }
  0xae   : > { %v2966_v61 = vsel %vm1439_vm7, %v2934_v59, %v2806_v33  ;;  %v741_v27 = vsel %vm714_vm0, %v739_v22, %v740_v5  ;;  %v2268_v33 = vrot.slane %v4812_v52, 1  ;;  %v1054_v18 = vshll.u32 %v3461_v26, 16  ;;  %v4947_v22 = vld [vmem:[%s4203_s16 + $0x80] ss:$0 sps:$4 sm:$0x11]  }
  0xaf   : > { %2815 = vrot.lane.b32.xlu1 %v2775_v20, %s4163_s25  ;;  %3876 = vmatmul.mubr.msk.bf16.vlgmr.msra.gmra.mrb[0].mxu1 %vm1484_vm8, %v2966_v61  ;;  %v1278_v44 = vpop.permute.xlu0 %1277  ;;  %v2087_v20 = vshll.u32 %v4887_v19, 16  ;;  %v556_v59 = vor.u32 %v555_v4, %v551_v40  ;;  %v3703_v61 = vcombine.low %v3599_v45, %v4911_v6  ;;  %v743_v36 = vrot.slane %v4864_v34, 1  ;;  %v3359_v4 = vld [vmem:[%s4203_s16 + $0x78] sm:$0xf]  ;;  %v4956_v1 = vld [vmem:[%s4203_s16 + $0x88] sm:$0xf] }
  0xb0   : > { %v1443_v41 = vsel %vm1439_vm7, %v1410_v37, %v1278_v44  ;;  %v2085_v37 = vor.u32 %v2084_v3, %v2080_v53  ;;  %v2269_v24 = vsel %vm714_vm0, %v2267_v48, %v2268_v33  ;;  %v742_v2 = vrot.slane %v3446_v46, 1  ;;  %v3639_v46 = vld [vmem:[%s4203_s16 + $0x78] sm:$0xe] }
  0xb1   : > { %v4880_v63 = vpop.permute.xlu1 %2167  ;;  %2689 = vrot.lane.b32.xlu0 %v2578_v62, %s4162_s24  ;;  %3840 = vmatmul.mubr.msk.bf16.vlgmr.msra.gmra.mrb[0].mxu0 %vm1484_vm8, %v1443_v41  ;;  %v561_v9 = vsel %vm441_vm1, %v556_v59, %v560_v57  ;;  %v2089_v44 = vrot.slane %v2087_v20, 1  ;;  %v4929_v41 = vld [vmem:[%s4203_s16 + $0x74] ss:$0 sps:$4 sm:$0x11]   ;;  %v2582_v12 = vshll.u32 %v3703_v61, 16  ;;  %v1052_v40 = vshrl.u32 %v3461_v26, 16 }
  0xb2   : > { %v1056_v49 = vrot.slane %v1054_v18, 1  ;;  %v1059_v56 = vshll.u32 %v4929_v41, 16  ;;  %v3493_v23 = vcombine.low %v3397_v11, %v4893_v54  ;;  %v2271_v57 = vrot.slane %v4887_v19, 1  ;;  %v3601_v20 = vld [vmem:[%s4203_s16 + $0x84] sm:$0xf] }
  0xb3   : > { %2817 = vrot.lane.b32.xlu1 %v2778_v15, %s4163_s25  ;;  %v4896_v42 = vpop.permute.xlu0 %638  ;;  %v3576_v15 = vld [vmem:[%s4203_s16 + $0x78] sm:$0xe]  ;;  %v2580_v48 = vshrl.u32 %v3703_v61, 16  ;;  %v2584_v54 = vrot.slane %v2582_v12, 1  ;;  %v2587_v19 = vshll.u32 %v4947_v22, 16  ;;  %v4964_v33 = vcombine.low %v3601_v20, %v4956_v1 }
  0xb4   : > { %v3688_v43 = vcombine.low %v3576_v15, %v4853_v35  ;;  %v3462_v35 = vcombine.low %v3359_v4, %v3360_v30  ;;  %v1057_v53 = vor.u32 %v1056_v49, %v1052_v40  ;;  %v1251_v12 = vrot.slane %v3493_v23, 1  ;;  %v204_v20 = vld [vmem:[%s4203_s16 + $0x78] sm:$0xf] }
  0xb5   : > { %v4901_v25 = vpop.permute.xlu1 %767  ;;  %1289 = vrot.lane.b32.xlu0 %v1250_v17, %s4163_s25  ;;  %v2090_v17 = vsel %vm441_vm1, %v2085_v37, %v2089_v44  ;;  %v4972_v44 = vld [vmem:[%s4203_s16 + $0x80] ss:$0 sps:$4 sm:$0x11]   ;;  %v2589_v11 = vrot.slane %v2587_v19, 1  ;;  %v1313_v40 = vsel %vm1307_vm3, %v4333_v0, %v4896_v42  ;;  %v2594_v49 = vshll.u32 %v4964_v33, 16 }
  0xb6   : > { %v2270_v59 = vrot.slane %v3688_v43, 1  ;;  %v4985_v43 = vld [vmem:[%s4203_s16 + $0x8c] ss:$0 sps:$4 sm:$0x11]   ;;  %v3735_v4 = vcombine.low %v3639_v46, %v4911_v6  ;;  %v4996_v0 = vld [vmem:[%s4203_s16 + $0x7c] sm:$0xf]  ;;  %v1346_v42 = vsel %vm1340_vm4, %v1313_v40, %v4901_v25 }
  0xb7   : > { %2179 = vrot.lane.b32.xlu1 %v2078_v7, %s4161_s19  ;;  %v4914_v8 = vpop.permute.xlu0 %640  ;;  %v3398_v7 = vld [vmem:[%s4203_s16 + $0x78] sm:$0xe]  ;;  %v5014_v46 = vcombine.low %v204_v20, %v4996_v0 }
  0xb8   : > { %v3494_v3 = vcombine.low %v3398_v7, %v3360_v30  ;;  %v2272_v37 = vsel %vm714_vm0, %v2270_v59, %v2271_v57  ;;  %v4991_v7 = vld [vmem:[%s4203_s16 + $0x88] sm:$0xf]  ;;  %v1071_v57 = vshll.u32 %v4972_v44, 16  ;;  %v2592_v59 = vshrl.u32 %v4964_v33, 16 }
  0xb9   : > { %v4918_v62 = vpop.permute.xlu1 %2295  ;;  %650 = vrot.lane.b32.xlu0 %v549_v47, %s4161_s19  ;;  %v744_v47 = vsel %vm714_vm0, %v742_v2, %v743_v36  ;;  %v2585_v36 = vor.u32 %v2584_v54, %v2580_v48  ;;  %v3640_v2 = vld [vmem:[%s4203_s16 + $0x84] sm:$0xe]  ;;  %v2779_v19 = vrot.slane %v3735_v4, 1 }
  0xbb   : > { %779 = vrot.lane.b32.xlu1 %v741_v27, %s4160_s18  ;;  %v4926_v52 = vpop.permute.xlu0 %2169  ;;  %v1061_v27 = vrot.slane %v1059_v56, 1  ;;  %v3539_v56 = vld [vmem:[%s4203_s16 + $0x84] sm:$0xf]  ;;  %v2590_v6 = vsel %vm441_vm1, %v2585_v36, %v2589_v11 }
  0xbc   : > { %v5008_v48 = vcombine.low %v3539_v56, %v4991_v7  ;;  %v2842_v4 = vsel %vm1307_vm3, %v4372_v31, %v4926_v52 }
  0xbd   : > { %v4933_v51 = vpop.permute.xlu1 %879  ;;  %652 = vrot.lane.b32.xlu0 %v561_v9, %s4161_s19  ;;  %v1066_v9 = vshll.u32 %v3462_v35, 16 }
  0xbf   : > { %2307 = vrot.lane.b32.xlu1 %v2269_v24, %s4160_s18  ;;  %v4942_v34 = vpop.permute.xlu0 %769  ;;  %v1062_v24 = vsel %vm441_vm1, %v1057_v53, %v1061_v27  ;;  %v1068_v23 = vrot.slane %v1066_v9, 1  ;;  %v1379_v53 = vsel %vm1373_vm5, %v1346_v42, %v4933_v51  ;;  %v2599_v27 = vshll.u32 %v4985_v43, 16  ;;  %v3541_v42 = vld [vmem:[%s4203_s16 + $0x90] sm:$0xf] }
  0xc0   : > { %v2840_v51 = vsel %vm1307_vm3, %v4327_v55, %v4880_v63  ;;  %v1255_v55 = vrot.slane %v4972_v44, 1  ;;  %v206_v63 = vld [vmem:[%s4203_s16 + $0x84] sm:$0xf]  ;;  %v2783_v44 = vrot.slane %v4985_v43, 1 }
  0xc1   : > { %v4949_v5 = vpop.permute.xlu1 %2407  ;;  %2181 = vrot.lane.b32.xlu0 %v2090_v17, %s4161_s19  ;;  %v1252_v17 = vrot.slane %v4929_v41, 1 }
  0xc3   : > { %891 = vrot.lane.b32.xlu1 %v3461_v26, %s4159_s17  ;;  %v4960_v45 = vpop.permute.xlu0 %2297  ;;  %v4969_v26 = vrot.slane %v3494_v3, 1  ;;  %v2596_v3 = vrot.slane %v2594_v49, 1  ;;  %v1253_v11 = vsel %vm714_vm0, %v1251_v12, %v1252_v17  ;;  %v5044_v12 = vld [vmem:[%s4203_s16 + $0x80] ss:$0 sps:$4 sm:$0x11]  }
  0xc4   : > { %v2874_v17 = vsel %vm1340_vm4, %v2842_v4, %v4960_v45  ;;  %v2092_v45 = vshrl.u32 %v5008_v48, 16  ;;  %v3577_v4 = vld [vmem:[%s4203_s16 + $0x84] sm:$0xe] }
  0xc5   : > { %v1152_v18 = vpop.permute.xlu1 %1151  ;;  %781 = vrot.lane.b32.xlu0 %v744_v47, %s4160_s18  ;;  %v3736_v47 = vcombine.low %v3640_v2, %v4956_v1  ;;  %v2780_v1 = vrot.slane %v4947_v22, 1  ;;  %v5031_v2 = vld [vmem:[%s4203_s16 + $0x88] sm:$0xf]  ;;  %v2597_v49 = vor.u32 %v2596_v3, %v2592_v59  ;;  %v242_v3 = vld [vmem:[%s4203_s16 + $0x78] sm:$0xe] }
  0xc6   : > { %v1412_v25 = vsel %vm1406_vm6, %v1379_v53, %v1152_v18  ;;  %v5021_v18 = vld [vmem:[%s4203_s16 + $0x8c] ss:$0 sps:$4 sm:$0x11]   ;;  %v5052_v52 = vcombine.low %v206_v63, %v5031_v2 }
  0xc7   : > { %2419 = vrot.lane.b32.xlu1 %v3703_v61, %s4159_s17  ;;  %v4975_v15 = vpop.permute.xlu0 %881  ;;  %v1064_v61 = vshrl.u32 %v3462_v35, 16  ;;  %v2782_v36 = vrot.slane %v3736_v47, 1  ;;  %v2099_v20 = vshll.u32 %v5021_v18, 16  ;;  %v1315_v47 = vsel %vm1307_vm3, %v4351_v14, %v4914_v8 }
  0xc9   : > { %v2680_v30 = vpop.permute.xlu1 %2679  ;;  %2309 = vrot.lane.b32.xlu0 %v2272_v37, %s4160_s18  ;;  %v1069_v37 = vor.u32 %v1068_v23, %v1064_v61  ;;  %v2601_v61 = vrot.slane %v2599_v27, 1  ;;  %v1348_v27 = vsel %vm1340_vm4, %v1315_v47, %v4942_v34  ;;  %v2101_v63 = vrot.slane %v2099_v20, 1 }
  0xca   : > { %v1381_v14 = vsel %vm1373_vm5, %v1348_v27, %v4975_v15 }
  0xcb   : > { %1163 = vrot.lane.b32.xlu1 %v1062_v24, %s4162_s24  ;;  %v2410_v41 = vpop.permute.xlu0 %2409  ;;  %v1073_v24 = vrot.slane %v1071_v57, 1  ;;  %v2602_v59 = vsel %vm441_vm1, %v2597_v49, %v2601_v61 }
  0xcd   : > { %v1280_v54 = vpop.permute.xlu1 %1279  ;;  %893 = vrot.lane.b32.xlu0 %v3462_v35, %s4159_s17  ;;  %v2872_v35 = vsel %vm1340_vm4, %v2840_v51, %v4918_v62  ;;  %v2094_v62 = vshll.u32 %v5008_v48, 16  ;;  %v1074_v31 = vsel %vm441_vm1, %v1069_v37, %v1073_v24  ;;  %v5076_v51 = vld [vmem:[%s4203_s16 + $0x8c] ss:$0 sps:$4 sm:$0x11]  }
  0xce   : > { %v1445_v9 = vsel %vm1439_vm7, %v1412_v25, %v1280_v54  ;;  %v2904_v40 = vsel %vm1373_vm5, %v2872_v35, %v4949_v5  ;;  %v565_v5 = vshll.u32 %v5014_v46, 16  ;;  %v563_v54 = vshrl.u32 %v5014_v46, 16 }
  0xcf   : > { %2691 = vrot.lane.b32.xlu1 %v2590_v6, %s4162_s24  ;;  %3843 = vmatprep.mubr.msk.bf16.mxu0 %vm1484_vm8, %v1445_v9  ;;  %v1154_v22 = vpop.permute.xlu0 %1153  ;;  %v2936_v56 = vsel %vm1406_vm6, %v2904_v40, %v2680_v30  ;;  %v2781_v30 = vsel %vm714_vm0, %v2779_v19, %v2780_v1  ;;  %v5062_v6 = vld [vmem:[%s4203_s16 + $0x94] sm:$0xf]  ;;  %v2096_v53 = vrot.slane %v2094_v62, 1  ;;  %v570_v1 = vshll.u32 %v5044_v12, 16 }
  0xd0   : > { %v567_v19 = vrot.slane %v565_v5, 1  ;;  %v577_v9 = vshll.u32 %v5052_v52, 16  ;;  %v5083_v37 = vcombine.low %v3541_v42, %v5062_v6  ;;  %v1414_v34 = vsel %vm1406_vm6, %v1381_v14, %v1154_v22 }
  0xd1   : > { %v2808_v23 = vpop.permute.xlu1 %2807  ;;  %2421 = vrot.lane.b32.xlu0 %v4964_v33, %s4159_s17  ;;  %v2906_v33 = vsel %vm1373_vm5, %v2874_v17, %v2410_v41  ;;  %v2784_v35 = vsel %vm714_vm0, %v2782_v36, %v2783_v44  ;;  %v3447_v40 = vcombine.low %v242_v3, %v4996_v0  ;;  %v572_v61 = vrot.slane %v570_v1, 1  ;;  %v5101_v0 = vld [vmem:[%s4203_s16 + $0x98] ss:$0 sps:$4 sm:$0x11]  }
  0xd2   : > { %v2968_v57 = vsel %vm1439_vm7, %v2936_v56, %v2808_v23  ;;  %v568_v22 = vor.u32 %v567_v19, %v563_v54  ;;  %v582_v62 = vshll.u32 %v5076_v51, 16  ;;  %v1256_v36 = vsel %vm714_vm0, %v4969_v26, %v1255_v55 }
  0xd3   : > { %1291 = vrot.lane.b32.xlu1 %v1253_v11, %s4163_s25  ;;  %3879 = vmatprep.mubr.msk.bf16.mxu1 %vm1484_vm8, %v2968_v57  ;;  %v2682_v43 = vpop.permute.xlu0 %2681  ;;  %v2097_v11 = vor.u32 %v2096_v53, %v2092_v45  ;;  %v575_v56 = vshrl.u32 %v5052_v52, 16  ;;  %v579_v23 = vrot.slane %v577_v9, 1  ;;  %v2106_v44 = vshll.u32 %v5083_v37, 16  ;;  %v5116_v45 = vld [vmem:[%s4203_s16 + $0x88] sm:$0xf] }
  0xd4   : > { %v2938_v41 = vsel %vm1406_vm6, %v2906_v33, %v2682_v43  ;;  %v745_v57 = vrot.slane %v3447_v40, 1  ;;  %v3689_v26 = vcombine.low %v3577_v4, %v4991_v7  ;;  %v573_v33 = vsel %vm441_vm1, %v568_v22, %v572_v61  ;;  %v5126_v53 = vld [vmem:[%s4203_s16 + $0x94] sm:$0xf] }
  0xd5   : > { %v2810_v25 = vpop.permute.xlu1 %2809  ;;  %1165 = vrot.lane.b32.xlu0 %v1074_v31, %s4162_s24  ;;  %v2102_v17 = vsel %vm441_vm1, %v2097_v11, %v2101_v63  ;;  %v746_v31 = vrot.slane %v5044_v12, 1  ;;  %v584_v43 = vrot.slane %v582_v62, 1  ;;  %v580_v20 = vor.u32 %v579_v23, %v575_v56  ;;  %v243_v12 = vld [vmem:[%s4203_s16 + $0x84] sm:$0xe]  ;;  %v3363_v63 = vld [vmem:[%s4203_s16 + $0x90] sm:$0xf] }
  0xd6   : > { %v2970_v8 = vsel %vm1439_vm7, %v2938_v41, %v2810_v25  ;;  %v2104_v42 = vshrl.u32 %v5083_v37, 16  ;;  %v2108_v47 = vrot.slane %v2106_v44, 1  ;;  %v2111_v41 = vshll.u32 %v5101_v0, 16 }
  0xd7   : > { %2819 = vrot.lane.b32.xlu1 %v2781_v30, %s4163_s25  ;;  %3880 = vmatmul.mubr.msk.bf16.gmra.mrb[4].mxu1 %vm1484_vm8, %v2970_v8  ;;  %v1282_v24 = vpop.permute.xlu0 %1281  ;;  %v3361_v30 = vld [vmem:[%s4203_s16 + $0x84] sm:$0xf]  ;;  %v747_v3 = vsel %vm714_vm0, %v745_v57, %v746_v31  ;;  %v2273_v27 = vrot.slane %v3689_v26, 1  ;;  %v2274_v25 = vrot.slane %v5021_v18, 1  ;;  %v3448_v1 = vcombine.low %v243_v12, %v5031_v2  ;;  %v5147_v2 = vld [vmem:[%s4203_s16 + $0x94] sm:$0xf] }
  0xd8   : > { %v1447_v15 = vsel %vm1439_vm7, %v1414_v34, %v1282_v24  ;;  %v3463_v54 = vcombine.low %v3361_v30, %v5116_v45  ;;  %v585_v14 = vsel %vm441_vm1, %v580_v20, %v584_v43  ;;  %v2109_v8 = vor.u32 %v2108_v47, %v2104_v42  ;;  %v3578_v24 = vld [vmem:[%s4203_s16 + $0x90] sm:$0xe]  ;;  %v3605_v30 = vld [vmem:[%s4203_s16 + $0x9c] sm:$0xf] }
  0xd9   : > { %v5091_v49 = vpop.permute.xlu1 %2171  ;;  %2693 = vrot.lane.b32.xlu0 %v2602_v59, %s4162_s24  ;;  %3844 = vmatmul.mubr.msk.bf16.gmra.mrb[4].mxu0 %vm1484_vm8, %v1447_v15  ;;  %v3603_v59 = vld [vmem:[%s4203_s16 + $0x90] sm:$0xf]  ;;  %v2113_v9 = vrot.slane %v2111_v41, 1  ;;  %v2275_v15 = vsel %vm714_vm0, %v2273_v27, %v2274_v25  ;;  %v748_v22 = vrot.slane %v3448_v1, 1  ;;  %v749_v61 = vrot.slane %v5076_v51, 1 }
  0xda   : > { %v3705_v34 = vcombine.low %v3603_v59, %v5126_v53  ;;  %v1078_v11 = vshll.u32 %v3463_v54, 16  ;;  %v3690_v62 = vcombine.low %v3578_v24, %v5062_v6  ;;  %v5162_v44 = vcombine.low %v3363_v63, %v5147_v2  ;;  %v5174_v41 = vld [vmem:[%s4203_s16 + $0xa0] sm:$0xf] }
  0xdb   : > { %2821 = vrot.lane.b32.xlu1 %v2784_v35, %s4163_s25  ;;  %v5105_v5 = vpop.permute.xlu0 %642  ;;  %v5142_v35 = vld [vmem:[%s4203_s16 + $0x8c] ss:$0 sps:$4 sm:$0x11]   ;;  %v2114_v4 = vsel %vm441_vm1, %v2109_v8, %v2113_v9  ;;  %v1076_v57 = vshrl.u32 %v3463_v54, 16  ;;  %v750_v26 = vsel %vm714_vm0, %v748_v22, %v749_v61  ;;  %v2277_v43 = vrot.slane %v5101_v0, 1 }
  0xdc   : > { %v2606_v56 = vshll.u32 %v3705_v34, 16  ;;  %v1080_v51 = vrot.slane %v1078_v11, 1  ;;  %v1083_v6 = vshll.u32 %v5142_v35, 16  ;;  %v2604_v20 = vshrl.u32 %v3705_v34, 16 }
  0xdd   : > { %v5110_v55 = vpop.permute.xlu1 %771  ;;  %1293 = vrot.lane.b32.xlu0 %v1256_v36, %s4163_s25  ;;  %v5156_v36 = vld [vmem:[%s4203_s16 + $0x98] ss:$0 sps:$4 sm:$0x11]   ;;  %v1090_v27 = vshll.u32 %v5162_v44, 16  ;;  %v1258_v24 = vrot.slane %v5142_v35, 1  ;;  %v1088_v63 = vshrl.u32 %v5162_v44, 16 }
  0xde   : > { %v2608_v42 = vrot.slane %v2606_v56, 1  ;;  %v2611_v47 = vshll.u32 %v5156_v36, 16  ;;  %v1081_v25 = vor.u32 %v1080_v51, %v1076_v57  ;;  %v1085_v0 = vrot.slane %v1083_v6, 1  ;;  %v3642_v56 = vld [vmem:[%s4203_s16 + $0x9c] sm:$0xe] }
  0xdf   : > { %2183 = vrot.lane.b32.xlu1 %v2102_v17, %s4161_s19  ;;  %v5122_v7 = vpop.permute.xlu0 %644  ;;  %v3399_v17 = vld [vmem:[%s4203_s16 + $0x84] sm:$0xe]  ;;  %v1092_v22 = vrot.slane %v1090_v27, 1  ;;  %v3543_v51 = vld [vmem:[%s4203_s16 + $0x9c] sm:$0xf] }
  0xe0   : > { %v3495_v12 = vcombine.low %v3399_v17, %v5116_v45  ;;  %v5187_v45 = vcombine.low %v3605_v30, %v5174_v41  ;;  %v2613_v8 = vrot.slane %v2611_v47, 1  ;;  %v1086_v35 = vsel %vm441_vm1, %v1081_v25, %v1085_v0  ;;  %v3400_v17 = vld [vmem:[%s4203_s16 + $0x90] sm:$0xe]  ;;  %v5209_v6 = vld [vmem:[%s4203_s16 + $0xa0] sm:$0xf] }
  0xe1   : > { %v5131_v19 = vpop.permute.xlu1 %2299  ;;  %654 = vrot.lane.b32.xlu0 %v573_v33, %s4161_s19  ;;  %v2276_v33 = vrot.slane %v3690_v62, 1  ;;  %v5197_v62 = vld [vmem:[%s4203_s16 + $0xa4] ss:$0 sps:$4 sm:$0x11]   ;;  %v208_v30 = vld [vmem:[%s4203_s16 + $0x90] sm:$0xf]  ;;  %v3496_v25 = vcombine.low %v3400_v17, %v5147_v2  ;;  %v5227_v0 = vcombine.low %v3543_v51, %v5209_v6  ;;  %v2844_v2 = vsel %vm1307_vm3, %v4467_v10, %v5091_v49 }
  0xe2   : > { %v1257_v9 = vrot.slane %v3495_v12, 1  ;;  %v2618_v57 = vshll.u32 %v5187_v45, 16  ;;  %v2623_v12 = vshll.u32 %v5197_v62, 16  ;;  %v2789_v10 = vrot.slane %v5197_v62, 1  ;;  %v210_v49 = vld [vmem:[%s4203_s16 + $0x9c] sm:$0xf] }
  0xe3   : > { %783 = vrot.lane.b32.xlu1 %v747_v3, %s4160_s18  ;;  %v5139_v18 = vpop.permute.xlu0 %2173  ;;  %v5181_v3 = vld [vmem:[%s4203_s16 + $0x98] ss:$0 sps:$4 sm:$0x11]  }
  0xe4   : > { %v1095_v61 = vshll.u32 %v5181_v3, 16  ;;  %v2846_v17 = vsel %vm1307_vm3, %v4512_v50, %v5139_v18 }
  0xe5   : > { %v5149_v40 = vpop.permute.xlu1 %883  ;;  %656 = vrot.lane.b32.xlu0 %v585_v14, %s4161_s19  ;;  %v2278_v14 = vsel %vm714_vm0, %v2276_v33, %v2277_v43  ;;  %v1259_v33 = vsel %vm714_vm0, %v1257_v9, %v1258_v24  ;;  %v5234_v9 = vld [vmem:[%s4203_s16 + $0xa4] ss:$0 sps:$4 sm:$0x11]   ;;  %v2786_v24 = vrot.slane %v5156_v36, 1 }
  0xe6   : > { %v1097_v47 = vrot.slane %v1095_v61, 1  ;;  %v2625_v61 = vrot.slane %v2623_v12, 1 }
  0xe7   : > { %2311 = vrot.lane.b32.xlu1 %v2275_v15, %s4160_s18  ;;  %v5159_v23 = vpop.permute.xlu0 %773  ;;  %v3641_v15 = vld [vmem:[%s4203_s16 + $0x90] sm:$0xe] }
  0xe8   : > { %v3737_v43 = vcombine.low %v3641_v15, %v5126_v53  ;;  %v3738_v53 = vcombine.low %v3642_v56, %v5174_v41  ;;  %v2876_v15 = vsel %vm1340_vm4, %v2844_v2, %v5131_v19  ;;  %v1260_v56 = vrot.slane %v3496_v25, 1 }
  0xe9   : > { %v5166_v31 = vpop.permute.xlu1 %2411  ;;  %2185 = vrot.lane.b32.xlu0 %v2114_v4, %s4161_s19  ;;  %v1317_v4 = vsel %vm1307_vm3, %v4472_v16, %v5105_v5  ;;  %v5216_v16 = vld [vmem:[%s4203_s16 + $0x94] sm:$0xf]  ;;  %v2118_v19 = vshll.u32 %v5227_v0, 16 }
  0xea   : > { %v1350_v5 = vsel %vm1340_vm4, %v1317_v4, %v5110_v55  ;;  %v5255_v4 = vld [vmem:[%s4203_s16 + $0xa0] sm:$0xf]  ;;  %v2908_v36 = vsel %vm1373_vm5, %v2876_v15, %v5166_v31 }
  0xeb   : > { %895 = vrot.lane.b32.xlu1 %v3463_v54, %s4159_s17  ;;  %v5178_v59 = vpop.permute.xlu0 %2301  ;;  %v2609_v54 = vor.u32 %v2608_v42, %v2604_v20  ;;  %v1093_v42 = vor.u32 %v1092_v22, %v1088_v63  ;;  %v1383_v27 = vsel %vm1373_vm5, %v1350_v5, %v5149_v40  ;;  %v5237_v40 = vcombine.low %v208_v30, %v5216_v16 }
  0xec   : > { %v2878_v31 = vsel %vm1340_vm4, %v2846_v17, %v5178_v59  ;;  %v1261_v30 = vrot.slane %v5181_v3, 1  ;;  %v5272_v50 = vcombine.low %v210_v49, %v5255_v4  ;;  %v2123_v59 = vshll.u32 %v5234_v9, 16  ;;  %v3579_v17 = vld [vmem:[%s4203_s16 + $0x9c] sm:$0xe] }
  0xed   : > { %v1156_v1 = vpop.permute.xlu1 %1155  ;;  %785 = vrot.lane.b32.xlu0 %v750_v26, %s4160_s18  ;;  %v2614_v26 = vsel %vm441_vm1, %v2609_v54, %v2613_v8  ;;  %v2616_v54 = vshrl.u32 %v5187_v45, 16  ;;  %v2620_v8 = vrot.slane %v2618_v57, 1  ;;  %v1098_v22 = vsel %vm441_vm1, %v1093_v42, %v1097_v47  ;;  %v3545_v42 = vld [vmem:[%s4203_s16 + $0xa8] sm:$0xf]  ;;  %v5282_v47 = vld [vmem:[%s4203_s16 + $0xac] sm:$0xf] }
  0xee   : > { %v1416_v55 = vsel %vm1406_vm6, %v1383_v27, %v1156_v1  ;;  %v2785_v1 = vrot.slane %v3737_v43, 1  ;;  %v1319_v3 = vsel %vm1307_vm3, %v4492_v32, %v5122_v7  ;;  %v2120_v12 = vrot.slane %v2118_v19, 1  ;;  %v244_v27 = vld [vmem:[%s4203_s16 + $0x90] sm:$0xe] }
  0xef   : > { %2423 = vrot.lane.b32.xlu1 %v3705_v34, %s4159_s17  ;;  %v5192_v11 = vpop.permute.xlu0 %885  ;;  %v2621_v62 = vor.u32 %v2620_v8, %v2616_v54  ;;  %v5296_v8 = vld [vmem:[%s4203_s16 + $0xa4] ss:$0 sps:$4 sm:$0x11]   ;;  %v601_v2 = vshll.u32 %v5272_v50, 16 }
  0xf0   : > { %v606_v19 = vshll.u32 %v5296_v8, 16 }
  0xf1   : > { %v2684_v34 = vpop.permute.xlu1 %2683  ;;  %2313 = vrot.lane.b32.xlu0 %v2278_v14, %s4160_s18 }
  0xf2   : > { %v2940_v57 = vsel %vm1406_vm6, %v2908_v36, %v2684_v34  ;;  %v2787_v34 = vsel %vm714_vm0, %v2785_v1, %v2786_v24 }
  0xf3   : > { %1167 = vrot.lane.b32.xlu1 %v1086_v35, %s4162_s24  ;;  %v2414_v20 = vpop.permute.xlu0 %2413  ;;  %v2788_v35 = vrot.slane %v3738_v53, 1  ;;  %v1352_v53 = vsel %vm1340_vm4, %v1319_v3, %v5159_v23 }
  0xf4   : > { %v2910_v18 = vsel %vm1373_vm5, %v2878_v31, %v2414_v20  ;;  %v1385_v32 = vsel %vm1373_vm5, %v1352_v53, %v5192_v11 }
  0xf5   : > { %v1284_v14 = vpop.permute.xlu1 %1283  ;;  %897 = vrot.lane.b32.xlu0 %v5162_v44, %s4159_s17  ;;  %v5245_v44 = vld [vmem:[%s4203_s16 + $0x98] ss:$0 sps:$4 sm:$0x11]   ;;  %v2790_v24 = vsel %vm714_vm0, %v2788_v35, %v2789_v10  ;;  %v1262_v10 = vsel %vm714_vm0, %v1260_v56, %v1261_v30  ;;  %v599_v35 = vshrl.u32 %v5272_v50, 16  ;;  %v3691_v56 = vcombine.low %v3579_v17, %v5209_v6 }
  0xf6   : > { %v1449_v41 = vsel %vm1439_vm7, %v1416_v55, %v1284_v14  ;;  %v594_v5 = vshll.u32 %v5245_v44, 16  ;;  %v2626_v55 = vsel %vm441_vm1, %v2621_v62, %v2625_v61  ;;  %v587_v14 = vshrl.u32 %v5237_v40, 16 }
  0xf7   : > { %2695 = vrot.lane.b32.xlu1 %v2614_v26, %s4162_s24  ;;  %3847 = vmatprep.mubr.msk.bf16.mxu0 %vm1484_vm8, %v1449_v41  ;;  %v1158_v63 = vpop.permute.xlu0 %1157  ;;  %v589_v26 = vshll.u32 %v5237_v40, 16  ;;  %v5303_v41 = vcombine.low %v3545_v42, %v5282_v47  ;;  %v3449_v61 = vcombine.low %v244_v27, %v5216_v16  ;;  %v2280_v27 = vrot.slane %v5234_v9, 1 }
  0xf8   : > { %v1418_v23 = vsel %vm1406_vm6, %v1385_v32, %v1158_v63  ;;  %v596_v36 = vrot.slane %v594_v5, 1 }
  0xf9   : > { %v2812_v51 = vpop.permute.xlu1 %2811  ;;  %2425 = vrot.lane.b32.xlu0 %v5187_v45, %s4159_s17  ;;  %v591_v54 = vrot.slane %v589_v26, 1  ;;  %v2130_v16 = vshll.u32 %v5303_v41, 16  ;;  %v751_v31 = vrot.slane %v3449_v61, 1  ;;  %v2128_v42 = vshrl.u32 %v5303_v41, 16  ;;  %v5366_v61 = vld [vmem:[%s4203_s16 + $0xac] sm:$0xf] }
  0xfa   : > { %v2972_v43 = vsel %vm1439_vm7, %v2940_v57, %v2812_v51  ;;  %v603_v57 = vrot.slane %v601_v2, 1  ;;  %v5320_v51 = vld [vmem:[%s4203_s16 + $0xb0] ss:$0 sps:$4 sm:$0x11]  }
  0xfb   : > { %1295 = vrot.lane.b32.xlu1 %v1259_v33, %s4163_s25  ;;  %3883 = vmatprep.mubr.msk.bf16.mxu1 %vm1484_vm8, %v2972_v43  ;;  %v2686_v45 = vpop.permute.xlu0 %2685  ;;  %v2116_v33 = vshrl.u32 %v5227_v0, 16  ;;  %v592_v63 = vor.u32 %v591_v54, %v587_v14  ;;  %v752_v43 = vrot.slane %v5245_v44, 1  ;;  %v2132_v3 = vrot.slane %v2130_v16, 1 }
  0xfc   : > { %v2942_v20 = vsel %vm1406_vm6, %v2910_v18, %v2686_v45  ;;  %v608_v45 = vrot.slane %v606_v19, 1  ;;  %v604_v5 = vor.u32 %v603_v57, %v599_v35  ;;  %v2135_v44 = vshll.u32 %v5320_v51, 16 }
  0xfd   : > { %v2814_v25 = vpop.permute.xlu1 %2813  ;;  %1169 = vrot.lane.b32.xlu0 %v1098_v22, %s4162_s24  ;;  %v2121_v15 = vor.u32 %v2120_v12, %v2116_v33  ;;  %v2125_v22 = vrot.slane %v2123_v59, 1  ;;  %v597_v18 = vsel %vm441_vm1, %v592_v63, %v596_v36  ;;  %v5335_v59 = vld [vmem:[%s4203_s16 + $0xa0] sm:$0xf]  ;;  %v753_v33 = vsel %vm714_vm0, %v751_v31, %v752_v43 }
  0xfe   : > { %v2974_v7 = vsel %vm1439_vm7, %v2942_v20, %v2814_v25  ;;  %v245_v20 = vld [vmem:[%s4203_s16 + $0x9c] sm:$0xe]  ;;  %v2279_v12 = vrot.slane %v3691_v56, 1  ;;  %v3607_v25 = vld [vmem:[%s4203_s16 + $0xa8] sm:$0xf]  ;;  %v609_v54 = vsel %vm441_vm1, %v604_v5, %v608_v45  ;;  %v2133_v32 = vor.u32 %v2132_v3, %v2128_v42 }
  0xff   : > { %2823 = vrot.lane.b32.xlu1 %v2787_v34, %s4163_s25  ;;  %3884 = vmatmul.mubr.msk.bf16.gmra.mrb[8].mxu1 %vm1484_vm8, %v2974_v7  ;;  %v1286_v1 = vpop.permute.xlu0 %1285  ;;  %v2126_v26 = vsel %vm441_vm1, %v2121_v15, %v2125_v22  ;;  %v3365_v34 = vld [vmem:[%s4203_s16 + $0x9c] sm:$0xf]  ;;  %v2137_v7 = vrot.slane %v2135_v44, 1  ;;  %v3450_v2 = vcombine.low %v245_v20, %v5255_v4  ;;  %v3367_v22 = vld [vmem:[%s4203_s16 + $0xa8] sm:$0xf]  ;;  %v755_v19 = vrot.slane %v5296_v8, 1 }
 0x100   : > { %v1451_v11 = vsel %vm1439_vm7, %v1418_v23, %v1286_v1  ;;  %v3465_v53 = vcombine.low %v3365_v34, %v5335_v59  ;;  %v3580_v1 = vld [vmem:[%s4203_s16 + $0xa8] sm:$0xe]  ;;  %v5381_v57 = vcombine.low %v3367_v22, %v5366_v61  ;;  %v5389_v8 = vld [vmem:[%s4203_s16 + $0xb8] sm:$0xf]  ;;  %v2283_v5 = vrot.slane %v5320_v51, 1 }
 0x101   : > { %v5311_v49 = vpop.permute.xlu1 %2175  ;;  %2697 = vrot.lane.b32.xlu0 %v2626_v55, %s4162_s24  ;;  %3848 = vmatmul.mubr.msk.bf16.gmra.mrb[8].mxu0 %vm1484_vm8, %v1451_v11  ;;  %v5348_v55 = vld [vmem:[%s4203_s16 + $0xac] sm:$0xf]  ;;  %v2281_v11 = vsel %vm714_vm0, %v2279_v12, %v2280_v27  ;;  %v2138_v4 = vsel %vm441_vm1, %v2133_v32, %v2137_v7  ;;  %v754_v36 = vrot.slane %v3450_v2, 1  ;;  %v3692_v17 = vcombine.low %v3580_v1, %v5282_v47  ;;  %v3609_v47 = vld [vmem:[%s4203_s16 + $0xb4] sm:$0xf] }
 0x102   : > { %v3707_v23 = vcombine.low %v3607_v25, %v5348_v55  ;;  %v1102_v15 = vshll.u32 %v3465_v53, 16  ;;  %v3643_v3 = vld [vmem:[%s4203_s16 + $0xa8] sm:$0xe]  ;;  %v5400_v12 = vld [vmem:[%s4203_s16 + $0xb0] ss:$0 sps:$4 sm:$0x11]   ;;  %v5405_v51 = vcombine.low %v3609_v47, %v5389_v8 }
 0x103   : > { %2825 = vrot.lane.b32.xlu1 %v2790_v24, %s4163_s25  ;;  %v5324_v62 = vpop.permute.xlu0 %646  ;;  %v5361_v24 = vld [vmem:[%s4203_s16 + $0xa4] ss:$0 sps:$4 sm:$0x11]   ;;  %v756_v45 = vsel %vm714_vm0, %v754_v36, %v755_v19  ;;  %v2282_v34 = vrot.slane %v3692_v17, 1  ;;  %v1114_v27 = vshll.u32 %v5381_v57, 16  ;;  %v3739_v1 = vcombine.low %v3643_v3, %v5348_v55 }
 0x104   : > { %v2630_v16 = vshll.u32 %v3707_v23, 16  ;;  %v1104_v31 = vrot.slane %v1102_v15, 1  ;;  %v1107_v43 = vshll.u32 %v5361_v24, 16  ;;  %v2628_v20 = vshrl.u32 %v3707_v23, 16  ;;  %v3547_v17 = vld [vmem:[%s4203_s16 + $0xb4] sm:$0xf] }
 0x105   : > { %v5329_v30 = vpop.permute.xlu1 %775  ;;  %1297 = vrot.lane.b32.xlu0 %v1262_v10, %s4163_s25  ;;  %v5375_v10 = vld [vmem:[%s4203_s16 + $0xb0] ss:$0 sps:$4 sm:$0x11]   ;;  %v2284_v7 = vsel %vm714_vm0, %v2282_v34, %v2283_v5  ;;  %v1112_v22 = vshrl.u32 %v5381_v57, 16  ;;  %v1119_v36 = vshll.u32 %v5400_v12, 16 }
 0x106   : > { %v2635_v42 = vshll.u32 %v5375_v10, 16  ;;  %v5416_v19 = vld [vmem:[%s4203_s16 + $0xbc] ss:$0 sps:$4 sm:$0x11]   ;;  %v5428_v47 = vld [vmem:[%s4203_s16 + $0xb8] sm:$0xf] }
 0x107   : > { %2187 = vrot.lane.b32.xlu1 %v2126_v26, %s4161_s19  ;;  %v5340_v6 = vpop.permute.xlu0 %648  ;;  %v1100_v26 = vshrl.u32 %v3465_v53, 16  ;;  %v212_v34 = vld [vmem:[%s4203_s16 + $0xa8] sm:$0xf]  ;;  %v1121_v3 = vrot.slane %v1119_v36, 1 }
 0x108   : > { %v2637_v2 = vrot.slane %v2635_v42, 1 }
 0x109   : > { %v5350_v14 = vpop.permute.xlu1 %2303  ;;  %658 = vrot.lane.b32.xlu0 %v597_v18, %s4161_s19  ;;  %v3401_v18 = vld [vmem:[%s4203_s16 + $0x9c] sm:$0xe]  ;;  %v1105_v25 = vor.u32 %v1104_v31, %v1100_v26  ;;  %v1264_v31 = vrot.slane %v5361_v24, 1 }
 0x10b   : > { %787 = vrot.lane.b32.xlu1 %v753_v33, %s4160_s18  ;;  %v5356_v9 = vpop.permute.xlu0 %2177  ;;  %v2632_v33 = vrot.slane %v2630_v16, 1 }
 0x10d   : > { %v5368_v63 = vpop.permute.xlu1 %887  ;;  %660 = vrot.lane.b32.xlu0 %v609_v54, %s4161_s19  ;;  %v1109_v54 = vrot.slane %v1107_v43, 1  ;;  %v2633_v15 = vor.u32 %v2632_v33, %v2628_v20  ;;  %v2642_v43 = vshll.u32 %v5405_v51, 16 }
 0x10f   : > { %2315 = vrot.lane.b32.xlu1 %v2281_v11, %s4160_s18  ;;  %v5378_v35 = vpop.permute.xlu0 %777  ;;  %v1110_v55 = vsel %vm441_vm1, %v1105_v25, %v1109_v54  ;;  %v2638_v42 = vsel %vm441_vm1, %v2633_v15, %v2637_v2  ;;  %v5445_v25 = vcombine.low %v3547_v17, %v5428_v47  ;;  %v5461_v15 = vld [vmem:[%s4203_s16 + $0xbc] ss:$0 sps:$4 sm:$0x11]  }
 0x111   : > { %v5384_v56 = vpop.permute.xlu1 %2415  ;;  %2189 = vrot.lane.b32.xlu0 %v2138_v4, %s4161_s19  ;;  %v1116_v4 = vrot.slane %v1114_v27, 1  ;;  %v3402_v27 = vld [vmem:[%s4203_s16 + $0xa8] sm:$0xe] }
 0x112   : > { %v3498_v36 = vcombine.low %v3402_v27, %v5366_v61 }
 0x113   : > { %899 = vrot.lane.b32.xlu1 %v3465_v53, %s4159_s17  ;;  %v5397_v44 = vpop.permute.xlu0 %2305  ;;  %v3497_v53 = vcombine.low %v3401_v18, %v5335_v59  ;;  %v1321_v59 = vsel %vm1307_vm3, %v4622_v28, %v5324_v62  ;;  %v2791_v18 = vrot.slane %v3739_v1, 1  ;;  %v5433_v28 = vld [vmem:[%s4203_s16 + $0xac] sm:$0xf]  ;;  %v1117_v24 = vor.u32 %v1116_v4, %v1112_v22 }
 0x114   : > { %v1354_v62 = vsel %vm1340_vm4, %v1321_v59, %v5329_v30  ;;  %v214_v59 = vld [vmem:[%s4203_s16 + $0xb4] sm:$0xf] }
 0x115   : > { %v1160_v32 = vpop.permute.xlu1 %1159  ;;  %789 = vrot.lane.b32.xlu0 %v756_v45, %s4160_s18  ;;  %v1263_v26 = vrot.slane %v3497_v53, 1  ;;  %v2792_v45 = vrot.slane %v5375_v10, 1  ;;  %v1387_v20 = vsel %vm1373_vm5, %v1354_v62, %v5368_v63  ;;  %v2647_v10 = vshll.u32 %v5416_v19, 16 }
 0x116   : > { %v1420_v30 = vsel %vm1406_vm6, %v1387_v20, %v1160_v32  ;;  %v2640_v53 = vshrl.u32 %v5405_v51, 16  ;;  %v5452_v63 = vcombine.low %v212_v34, %v5433_v28  ;;  %v1267_v34 = vrot.slane %v5400_v12, 1 }
 0x117   : > { %2427 = vrot.lane.b32.xlu1 %v3707_v23, %s4159_s17  ;;  %v5411_v11 = vpop.permute.xlu0 %889  ;;  %v3644_v23 = vld [vmem:[%s4203_s16 + $0xb4] sm:$0xe]  ;;  %v1265_v32 = vsel %vm714_vm0, %v1263_v26, %v1264_v31  ;;  %v2793_v1 = vsel %vm714_vm0, %v2791_v18, %v2792_v45  ;;  %v2649_v17 = vrot.slane %v2647_v10, 1  ;;  %v2142_v26 = vshll.u32 %v5445_v25, 16  ;;  %v246_v10 = vld [vmem:[%s4203_s16 + $0xa8] sm:$0xe] }
 0x118   : > { %v3740_v33 = vcombine.low %v3644_v23, %v5389_v8  ;;  %v2848_v8 = vsel %vm1307_vm3, %v4617_v39, %v5311_v49  ;;  %v1122_v39 = vsel %vm441_vm1, %v1117_v24, %v1121_v3  ;;  %v2795_v49 = vrot.slane %v5416_v19, 1  ;;  %v5501_v24 = vld [vmem:[%s4203_s16 + $0xc4] sm:$0xf] }
 0x119   : > { %v2688_v16 = vpop.permute.xlu1 %2687  ;;  %2317 = vrot.lane.b32.xlu0 %v2284_v7, %s4160_s18  ;;  %v2644_v7 = vrot.slane %v2642_v43, 1  ;;  %v2880_v22 = vsel %vm1340_vm4, %v2848_v8, %v5350_v14  ;;  %v2850_v31 = vsel %vm1307_vm3, %v4667_v29, %v5356_v9  ;;  %v613_v18 = vshll.u32 %v5452_v63, 16  ;;  %v3549_v9 = vld [vmem:[%s4203_s16 + $0xc0] sm:$0xf] }
 0x11a   : > { %v2912_v23 = vsel %vm1373_vm5, %v2880_v22, %v5384_v56  ;;  %v2794_v14 = vrot.slane %v3740_v33, 1  ;;  %v2882_v56 = vsel %vm1340_vm4, %v2850_v31, %v5397_v44  ;;  %v1266_v62 = vrot.slane %v3498_v36, 1 }
 0x11b   : > { %1171 = vrot.lane.b32.xlu1 %v1110_v55, %s4162_s24  ;;  %v2418_v5 = vpop.permute.xlu0 %2417  ;;  %v5475_v55 = vld [vmem:[%s4203_s16 + $0xb8] sm:$0xf]  ;;  %v2944_v43 = vsel %vm1406_vm6, %v2912_v23, %v2688_v16  ;;  %v2645_v61 = vor.u32 %v2644_v7, %v2640_v53  ;;  %v2147_v44 = vshll.u32 %v5461_v15, 16  ;;  %v1323_v12 = vsel %vm1307_vm3, %v4642_v58, %v5340_v6  ;;  %v5515_v7 = vld [vmem:[%s4203_s16 + $0xbc] ss:$0 sps:$4 sm:$0x11]  }
 0x11c   : > { %v5492_v29 = vcombine.low %v214_v59, %v5475_v55  ;;  %v2914_v16 = vsel %vm1373_vm5, %v2882_v56, %v2418_v5  ;;  %v2140_v5 = vshrl.u32 %v5445_v25, 16  ;;  %v2144_v20 = vrot.slane %v2142_v26, 1  ;;  %v3581_v26 = vld [vmem:[%s4203_s16 + $0xb4] sm:$0xe] }
 0x11d   : > { %v1288_v54 = vpop.permute.xlu1 %1287  ;;  %901 = vrot.lane.b32.xlu0 %v5381_v57, %s4159_s17  ;;  %v5464_v57 = vld [vmem:[%s4203_s16 + $0xb0] ss:$0 sps:$4 sm:$0x11]   ;;  %v1356_v33 = vsel %vm1340_vm4, %v1323_v12, %v5378_v35  ;;  %v615_v53 = vrot.slane %v613_v18, 1  ;;  %v2796_v22 = vsel %vm714_vm0, %v2794_v14, %v2795_v49  ;;  %v2149_v36 = vrot.slane %v2147_v44, 1 }
 0x11e   : > { %v1453_v2 = vsel %vm1439_vm7, %v1420_v30, %v1288_v54  ;;  %v2650_v30 = vsel %vm441_vm1, %v2645_v61, %v2649_v17  ;;  %v611_v54 = vshrl.u32 %v5452_v63, 16  ;;  %v1389_v58 = vsel %vm1373_vm5, %v1356_v33, %v5411_v11 }
 0x11f   : > { %2699 = vrot.lane.b32.xlu1 %v2638_v42, %s4162_s24  ;;  %3851 = vmatprep.mubr.msk.bf16.mxu0 %vm1484_vm8, %v1453_v2  ;;  %v1162_v4 = vpop.permute.xlu0 %1161  ;;  %v618_v42 = vshll.u32 %v5464_v57, 16  ;;  %v625_v8 = vshll.u32 %v5492_v29, 16  ;;  %v5522_v2 = vcombine.low %v3549_v9, %v5501_v24  ;;  %v3451_v59 = vcombine.low %v246_v10, %v5433_v28 }
 0x120   : > { %v1422_v35 = vsel %vm1406_vm6, %v1389_v58, %v1162_v4  ;;  %v616_v4 = vor.u32 %v615_v53, %v611_v54  ;;  %v630_v17 = vshll.u32 %v5515_v7, 16  ;;  %v1268_v49 = vsel %vm714_vm0, %v1266_v62, %v1267_v34  ;;  %v5554_v62 = vld [vmem:[%s4203_s16 + $0xb8] sm:$0xf]  ;;  %v5570_v54 = vld [vmem:[%s4203_s16 + $0xc4] sm:$0xf] }
 0x121   : > { %v2816_v19 = vpop.permute.xlu1 %2815  ;;  %2429 = vrot.lane.b32.xlu0 %v5405_v51, %s4159_s17  ;;  %v623_v14 = vshrl.u32 %v5492_v29, 16  ;;  %v627_v31 = vrot.slane %v625_v8, 1  ;;  %v2154_v28 = vshll.u32 %v5522_v2, 16  ;;  %v757_v18 = vrot.slane %v3451_v59, 1 }
 0x122   : > { %v2976_v45 = vsel %vm1439_vm7, %v2944_v43, %v2816_v19  ;;  %v5539_v43 = vld [vmem:[%s4203_s16 + $0xc8] ss:$0 sps:$4 sm:$0x11]   ;;  %v758_v56 = vrot.slane %v5464_v57, 1  ;;  %v2286_v10 = vrot.slane %v5461_v15, 1 }
 0x123   : > { %1299 = vrot.lane.b32.xlu1 %v1265_v32, %s4163_s25  ;;  %3887 = vmatprep.mubr.msk.bf16.mxu1 %vm1484_vm8, %v2976_v45  ;;  %v2690_v51 = vpop.permute.xlu0 %2689  ;;  %v3693_v45 = vcombine.low %v3581_v26, %v5428_v47  ;;  %v628_v44 = vor.u32 %v627_v31, %v623_v14  ;;  %v2156_v12 = vrot.slane %v2154_v28, 1  ;;  %v2159_v57 = vshll.u32 %v5539_v43, 16  ;;  %v5589_v26 = vld [vmem:[%s4203_s16 + $0xc4] sm:$0xf] }
 0x124   : > { %v2946_v3 = vsel %vm1406_vm6, %v2914_v16, %v2690_v51  ;;  %v632_v16 = vrot.slane %v630_v17, 1  ;;  %v3369_v51 = vld [vmem:[%s4203_s16 + $0xb4] sm:$0xf]  ;;  %v3371_v17 = vld [vmem:[%s4203_s16 + $0xc0] sm:$0xf] }
 0x125   : > { %v2818_v27 = vpop.permute.xlu1 %2817  ;;  %1173 = vrot.lane.b32.xlu0 %v1122_v39, %s4162_s24  ;;  %v2145_v39 = vor.u32 %v2144_v20, %v2140_v5  ;;  %v759_v5 = vsel %vm714_vm0, %v757_v18, %v758_v56  ;;  %v2285_v20 = vrot.slane %v3693_v45, 1  ;;  %v3467_v33 = vcombine.low %v3369_v51, %v5554_v62  ;;  %v5595_v14 = vld [vmem:[%s4203_s16 + $0xc8] ss:$0 sps:$4 sm:$0x11]  }
 0x126   : > { %v2978_v6 = vsel %vm1439_vm7, %v2946_v3, %v2818_v27  ;;  %v247_v3 = vld [vmem:[%s4203_s16 + $0xb4] sm:$0xe]  ;;  %v633_v53 = vsel %vm441_vm1, %v628_v44, %v632_v16  ;;  %v3613_v44 = vld [vmem:[%s4203_s16 + $0xcc] sm:$0xf] }
 0x127   : > { %2827 = vrot.lane.b32.xlu1 %v2793_v1, %s4163_s25  ;;  %3888 = vmatmul.mubr.msk.bf16.gmra.mrb[12].mxu1 %vm1484_vm8, %v2978_v6  ;;  %v1290_v32 = vpop.permute.xlu0 %1289  ;;  %v620_v1 = vrot.slane %v618_v42, 1  ;;  %v2150_v61 = vsel %vm441_vm1, %v2145_v39, %v2149_v36  ;;  %v2152_v42 = vshrl.u32 %v5522_v2, 16  ;;  %v2161_v6 = vrot.slane %v2159_v57, 1 }
 0x128   : > { %v1455_v11 = vsel %vm1439_vm7, %v1422_v35, %v1290_v32  ;;  %v3452_v8 = vcombine.low %v247_v3, %v5475_v55  ;;  %v3582_v35 = vld [vmem:[%s4203_s16 + $0xc0] sm:$0xe]  ;;  %v2287_v32 = vsel %vm714_vm0, %v2285_v20, %v2286_v10  ;;  %v1126_v39 = vshll.u32 %v3467_v33, 16  ;;  %v3403_v20 = vld [vmem:[%s4203_s16 + $0xb4] sm:$0xe] }
 0x129   : > { %v5530_v23 = vpop.permute.xlu1 %2179  ;;  %2701 = vrot.lane.b32.xlu0 %v2650_v30, %s4162_s24  ;;  %3852 = vmatmul.mubr.msk.bf16.gmra.mrb[12].mxu0 %vm1484_vm8, %v1455_v11  ;;  %v621_v9 = vsel %vm441_vm1, %v616_v4, %v620_v1  ;;  %v3611_v30 = vld [vmem:[%s4203_s16 + $0xc0] sm:$0xf]  ;;  %v2157_v58 = vor.u32 %v2156_v12, %v2152_v42  ;;  %v5581_v11 = vld [vmem:[%s4203_s16 + $0xbc] ss:$0 sps:$4 sm:$0x11]   ;;  %v761_v55 = vrot.slane %v5515_v7, 1  ;;  %v3694_v1 = vcombine.low %v3582_v35, %v5501_v24 }
 0x12a   : > { %v760_v4 = vrot.slane %v3452_v8, 1  ;;  %v1124_v31 = vshrl.u32 %v3467_v33, 16  ;;  %v1128_v28 = vrot.slane %v1126_v39, 1  ;;  %v3468_v24 = vcombine.low %v3371_v17, %v5589_v26  ;;  %v5609_v42 = vld [vmem:[%s4203_s16 + $0xd0] sm:$0xf] }
 0x12b   : > { %2829 = vrot.lane.b32.xlu1 %v2796_v22, %s4163_s25  ;;  %v5543_v19 = vpop.permute.xlu0 %650  ;;  %v3709_v22 = vcombine.low %v3611_v30, %v5570_v54  ;;  %v2162_v59 = vsel %vm441_vm1, %v2157_v58, %v2161_v6  ;;  %v2288_v45 = vrot.slane %v3694_v1, 1  ;;  %v5615_v30 = vld [vmem:[%s4203_s16 + $0xc8] ss:$0 sps:$4 sm:$0x11]   ;;  %v3499_v6 = vcombine.low %v3403_v20, %v5554_v62 }
 0x12c   : > { %v762_v56 = vsel %vm714_vm0, %v760_v4, %v761_v55  ;;  %v1129_v12 = vor.u32 %v1128_v28, %v1124_v31  ;;  %v1325_v8 = vsel %vm1307_vm3, %v4808_v21, %v5543_v19  ;;  %v1136_v55 = vshrl.u32 %v3468_v24, 16  ;;  %v5631_v17 = vld [vmem:[%s4203_s16 + $0xd4] ss:$0 sps:$4 sm:$0x11]  }
 0x12d   : > { %v5548_v34 = vpop.permute.xlu1 %779  ;;  %1301 = vrot.lane.b32.xlu0 %v1268_v49, %s4163_s25  ;;  %v2654_v18 = vshll.u32 %v3709_v22, 16  ;;  %v2652_v51 = vshrl.u32 %v3709_v22, 16 }
 0x12e   : > { %v1358_v31 = vsel %vm1340_vm4, %v1325_v8, %v5548_v34 }
 0x12f   : > { %2191 = vrot.lane.b32.xlu1 %v2150_v61, %s4161_s19  ;;  %v5559_v47 = vpop.permute.xlu0 %652  ;;  %v1131_v61 = vshll.u32 %v5581_v11, 16  ;;  %v2656_v3 = vrot.slane %v2654_v18, 1  ;;  %v1269_v18 = vrot.slane %v3499_v6, 1 }
 0x131   : > { %v5565_v27 = vpop.permute.xlu1 %2307  ;;  %662 = vrot.lane.b32.xlu0 %v621_v9, %s4161_s19  ;;  %v2289_v9 = vrot.slane %v5539_v43, 1  ;;  %v1133_v57 = vrot.slane %v1131_v61, 1  ;;  %v1138_v43 = vshll.u32 %v3468_v24, 16 }
 0x133   : > { %791 = vrot.lane.b32.xlu1 %v759_v5, %s4160_s18  ;;  %v5575_v15 = vpop.permute.xlu0 %2181  ;;  %v2659_v5 = vshll.u32 %v5595_v14, 16  ;;  %v1134_v35 = vsel %vm441_vm1, %v1129_v12, %v1133_v57  ;;  %v1140_v1 = vrot.slane %v1138_v43, 1  ;;  %v3646_v12 = vld [vmem:[%s4203_s16 + $0xcc] sm:$0xe] }
 0x134   : > { %v3742_v43 = vcombine.low %v3646_v12, %v5609_v42 }
 0x135   : > { %v892_v36 = vpop.permute.xlu1 %891  ;;  %664 = vrot.lane.b32.xlu0 %v633_v53, %s4161_s19  ;;  %v3710_v53 = vcombine.low %v3613_v44, %v5609_v42  ;;  %v2661_v39 = vrot.slane %v2659_v5, 1  ;;  %v3404_v5 = vld [vmem:[%s4203_s16 + $0xc0] sm:$0xe] }
 0x136   : > { %v1391_v28 = vsel %vm1373_vm5, %v1358_v31, %v892_v36 }
 0x137   : > { %2319 = vrot.lane.b32.xlu1 %v2287_v32, %s4160_s18  ;;  %v5592_v49 = vpop.permute.xlu0 %781  ;;  %v2657_v32 = vor.u32 %v2656_v3, %v2652_v51  ;;  %v2666_v62 = vshll.u32 %v3710_v53, 16  ;;  %v1141_v51 = vor.u32 %v1140_v1, %v1136_v55  ;;  %v2664_v44 = vshrl.u32 %v3710_v53, 16 }
 0x138   : > { %v2671_v3 = vshll.u32 %v5631_v17, 16 }
 0x139   : > { %v5598_v7 = vpop.permute.xlu1 %2419  ;;  %2193 = vrot.lane.b32.xlu0 %v2162_v59, %s4161_s19  ;;  %v3645_v59 = vld [vmem:[%s4203_s16 + $0xc0] sm:$0xe]  ;;  %v2662_v61 = vsel %vm441_vm1, %v2657_v32, %v2661_v39  ;;  %v2668_v57 = vrot.slane %v2666_v62, 1 }
 0x13a   : > { %v3741_v19 = vcombine.low %v3645_v59, %v5570_v54  ;;  %v2852_v54 = vsel %vm1307_vm3, %v4799_v60, %v5530_v23  ;;  %v2673_v42 = vrot.slane %v2671_v3, 1  ;;  %v2801_v59 = vrot.slane %v5631_v17, 1 }
 0x13b   : > { %903 = vrot.lane.b32.xlu1 %v3467_v33, %s4159_s17  ;;  %v5605_v16 = vpop.permute.xlu0 %2309  ;;  %v2290_v33 = vsel %vm714_vm0, %v2288_v45, %v2289_v9  ;;  %v2669_v32 = vor.u32 %v2668_v57, %v2664_v44 }
 0x13c   : > { %v2797_v20 = vrot.slane %v3741_v19, 1 }
 0x13d   : > { %v1164_v10 = vpop.permute.xlu1 %1163  ;;  %793 = vrot.lane.b32.xlu0 %v762_v56, %s4160_s18  ;;  %v1270_v56 = vrot.slane %v5581_v11, 1  ;;  %v2884_v11 = vsel %vm1340_vm4, %v2852_v54, %v5565_v27  ;;  %v2674_v31 = vsel %vm441_vm1, %v2669_v32, %v2673_v42 }
 0x13e   : > { %v1424_v45 = vsel %vm1406_vm6, %v1391_v28, %v1164_v10  ;;  %v2798_v10 = vrot.slane %v5595_v14, 1  ;;  %v2916_v60 = vsel %vm1373_vm5, %v2884_v11, %v5598_v7  ;;  %v3500_v14 = vcombine.low %v3404_v5, %v5589_v26 }
 0x13f   : > { %2431 = vrot.lane.b32.xlu1 %v3709_v22, %s4159_s17  ;;  %v5620_v58 = vpop.permute.xlu0 %893  ;;  %v1143_v22 = vshll.u32 %v5615_v30, 16  ;;  %v1271_v23 = vsel %vm714_vm0, %v1269_v18, %v1270_v56  ;;  %v1327_v26 = vsel %vm1307_vm3, %v4843_v38, %v5559_v47  ;;  %v1273_v38 = vrot.slane %v5615_v30, 1 }
 0x140   : > { %v1272_v1 = vrot.slane %v3500_v14, 1 }
 0x141   : > { %v2692_v4 = vpop.permute.xlu1 %2691  ;;  %2321 = vrot.lane.b32.xlu0 %v2290_v33, %s4160_s18  ;;  %v1145_v34 = vrot.slane %v1143_v22, 1  ;;  %v2854_v33 = vsel %vm1307_vm3, %v4871_v13, %v5575_v15  ;;  %v2799_v15 = vsel %vm714_vm0, %v2797_v20, %v2798_v10 }
 0x142   : > { %v2948_v27 = vsel %vm1406_vm6, %v2916_v60, %v2692_v4  ;;  %v2886_v7 = vsel %vm1340_vm4, %v2854_v33, %v5605_v16  ;;  %v2800_v16 = vrot.slane %v3742_v43, 1  ;;  %v1360_v4 = vsel %vm1340_vm4, %v1327_v26, %v5592_v49 }
 0x143   : > { %1175 = vrot.lane.b32.xlu1 %v1134_v35, %s4162_s24  ;;  %v2422_v21 = vpop.permute.xlu0 %2421  ;;  %v1146_v8 = vsel %vm441_vm1, %v1141_v51, %v1145_v34  ;;  %v1393_v22 = vsel %vm1373_vm5, %v1360_v4, %v5620_v58  ;;  %v1274_v58 = vsel %vm714_vm0, %v1272_v1, %v1273_v38 }
 0x144   : > { %v2918_v39 = vsel %vm1373_vm5, %v2886_v7, %v2422_v21  ;;  %v2802_v21 = vsel %vm714_vm0, %v2800_v16, %v2801_v59 }
 0x145   : > { %v1292_v9 = vpop.permute.xlu1 %1291  ;;  %905 = vrot.lane.b32.xlu0 %v3468_v24, %s4159_s17 }
 0x146   : > { %v1457_v36 = vsel %vm1439_vm7, %v1424_v45, %v1292_v9 }
 0x147   : > { %2703 = vrot.lane.b32.xlu1 %v2662_v61, %s4162_s24  ;;  %3855 = vmatprep.mubr.msk.bf16.mxu0 %vm1484_vm8, %v1457_v36  ;;  %v1166_v24 = vpop.permute.xlu0 %1165 }
 0x148   : > { %v1426_v47 = vsel %vm1406_vm6, %v1393_v22, %v1166_v24 }
 0x149   : > { %v2820_v6 = vpop.permute.xlu1 %2819  ;;  %2433 = vrot.lane.b32.xlu0 %v3710_v53, %s4159_s17 }
 0x14a   : > { %v2980_v35 = vsel %vm1439_vm7, %v2948_v27, %v2820_v6 }
 0x14b   : > { %1303 = vrot.lane.b32.xlu1 %v1271_v23, %s4163_s25  ;;  %3891 = vmatprep.mubr.msk.bf16.mxu1 %vm1484_vm8, %v2980_v35  ;;  %v2694_v13 = vpop.permute.xlu0 %2693 }
 0x14c   : > { %v2950_v53 = vsel %vm1406_vm6, %v2918_v39, %v2694_v13 }
 0x14d   : > { %v2822_v55 = vpop.permute.xlu1 %2821  ;;  %1177 = vrot.lane.b32.xlu0 %v1146_v8, %s4162_s24 }
 0x14e   : > { %v2982_v62 = vsel %vm1439_vm7, %v2950_v53, %v2822_v55 }
 0x14f   : > { %2831 = vrot.lane.b32.xlu1 %v2799_v15, %s4163_s25  ;;  %3892 = vmatmul.mubr.msk.bf16.gmra.mrb[16].mxu1 %vm1484_vm8, %v2982_v62  ;;  %v1294_v49 = vpop.permute.xlu0 %1293 }
 0x150   : > { %v1459_v17 = vsel %vm1439_vm7, %v1426_v47, %v1294_v49 }
 0x151   : > { %v2184_v19 = vpop.permute.xlu1 %2183  ;;  %2705 = vrot.lane.b32.xlu0 %v2674_v31, %s4162_s24  ;;  %3856 = vmatmul.mubr.msk.bf16.gmra.mrb[16].mxu0 %vm1484_vm8, %v1459_v17 }
 0x152   : > { %v2856_v20 = vsel %vm1307_vm3, %v5008_v48, %v2184_v19 }
 0x153   : > { %2833 = vrot.lane.b32.xlu1 %v2802_v21, %s4163_s25  ;;  %v655_v30 = vpop.permute.xlu0 %654 }
 0x154   : > { %v1329_v54 = vsel %vm1307_vm3, %v5014_v46, %v655_v30 }
 0x155   : > { %v784_v28 = vpop.permute.xlu1 %783  ;;  %1305 = vrot.lane.b32.xlu0 %v1274_v58, %s4163_s25 }
 0x156   : > { %v1362_v57 = vsel %vm1340_vm4, %v1329_v54, %v784_v28 }
 0x157   : > { %v657_v61 = vpop.permute.xlu0 %656 }
 0x158   : > { %v1331_v7 = vsel %vm1307_vm3, %v5052_v52, %v657_v61 }
 0x159   : > { %v2312_v18 = vpop.permute.xlu1 %2311 }
 0x15a   : > { %v2888_v60 = vsel %vm1340_vm4, %v2856_v20, %v2312_v18 }
 0x15b   : > { %v2186_v56 = vpop.permute.xlu0 %2185 }
 0x15c   : > { %v2858_v43 = vsel %vm1307_vm3, %v5083_v37, %v2186_v56 }
 0x15d   : > { %v896_v45 = vpop.permute.xlu1 %895 }
 0x15e   : > { %v1395_v5 = vsel %vm1373_vm5, %v1362_v57, %v896_v45 }
 0x15f   : > { %v786_v9 = vpop.permute.xlu0 %785 }
 0x160   : > { %v1364_v37 = vsel %vm1340_vm4, %v1331_v7, %v786_v9 }
 0x161   : > { %v2424_v51 = vpop.permute.xlu1 %2423 }
 0x162   : > { %v2920_v46 = vsel %vm1373_vm5, %v2888_v60, %v2424_v51 }
 0x163   : > { %v2314_v34 = vpop.permute.xlu0 %2313 }
 0x164   : > { %v2890_v6 = vsel %vm1340_vm4, %v2858_v43, %v2314_v34 }
 0x165   : > { %v1168_v44 = vpop.permute.xlu1 %1167 }
 0x166   : > { %v1428_v11 = vsel %vm1406_vm6, %v1395_v5, %v1168_v44 }
 0x167   : > { %v898_v12 = vpop.permute.xlu0 %897 }
 0x168   : > { %v1397_v42 = vsel %vm1373_vm5, %v1364_v37, %v898_v12 }
 0x169   : > { %v2696_v36 = vpop.permute.xlu1 %2695 }
 0x16a   : > { %v2952_v33 = vsel %vm1406_vm6, %v2920_v46, %v2696_v36 }
 0x16b   : > { %v2426_v3 = vpop.permute.xlu0 %2425 }
 0x16c   : > { %v2922_v48 = vsel %vm1373_vm5, %v2890_v6, %v2426_v3 }
 0x16d   : > { %v1296_v24 = vpop.permute.xlu1 %1295 }
 0x16e   : > { %v1461_v10 = vsel %vm1439_vm7, %v1428_v11, %v1296_v24 }
 0x16f   : > { %3859 = vmatprep.mubr.msk.bf16.mxu0 %vm1484_vm8, %v1461_v10  ;;  %v1170_v23 = vpop.permute.xlu0 %1169 }
 0x170   : > { %v1430_v13 = vsel %vm1406_vm6, %v1397_v42, %v1170_v23 }
 0x171   : > { %v2824_v27 = vpop.permute.xlu1 %2823 }
 0x172   : > { %v2984_v8 = vsel %vm1439_vm7, %v2952_v33, %v2824_v27 }
 0x173   : > { %3895 = vmatprep.mubr.msk.bf16.mxu1 %vm1484_vm8, %v2984_v8  ;;  %v2698_v14 = vpop.permute.xlu0 %2697 }
 0x174   : > { %v2954_v35 = vsel %vm1406_vm6, %v2922_v48, %v2698_v14 }
 0x175   : > { %v2826_v32 = vpop.permute.xlu1 %2825 }
 0x176   : > { %v2986_v39 = vsel %vm1439_vm7, %v2954_v35, %v2826_v32 }
 0x177   : > { %3896 = vmatmul.mubr.msk.bf16.gmra.mrb[20].mxu1 %vm1484_vm8, %v2986_v39  ;;  %v1298_v15 = vpop.permute.xlu0 %1297 }
 0x178   : > { %v1463_v26 = vsel %vm1439_vm7, %v1430_v13, %v1298_v15 }
 0x179   : > { %v2188_v53 = vpop.permute.xlu1 %2187  ;;  %3860 = vmatmul.mubr.msk.bf16.gmra.mrb[20].mxu0 %vm1484_vm8, %v1463_v26 }
 0x17a   : > { %v2860_v12 = vsel %vm1307_vm3, %v5227_v0, %v2188_v53 }
 0x17b   : > { %v659_v52 = vpop.permute.xlu0 %658 }
 0x17c   : > { %v1333_v18 = vsel %vm1307_vm3, %v5237_v40, %v659_v52 }
 0x17d   : > { %v788_v16 = vpop.permute.xlu1 %787 }
 0x17e   : > { %v1366_v45 = vsel %vm1340_vm4, %v1333_v18, %v788_v16 }
 0x17f   : > { %v661_v59 = vpop.permute.xlu0 %660 }
 0x180   : > { %v1335_v60 = vsel %vm1307_vm3, %v5272_v50, %v661_v59 }
 0x181   : > { %v2316_v4 = vpop.permute.xlu1 %2315 }
 0x182   : > { %v3877_v55 = vpop.f32.mrb[0].mxu1  ;;  %v2892_v36 = vsel %vm1340_vm4, %v2860_v12, %v2316_v4 }
 0x183   : > { %3766 = vst.msk [vmem:[%s5727_s5 + $0x30] sm:$0xff] %vm1340_vm4, %v3877_v55  ;;  %v3077_v1 = vpop.f32.mrb[1].mxu1  ;;  %v2190_v22 = vpop.permute.xlu0 %2189 }
 0x184   : > { %3764 = vst.msk [vmem:[%s5727_s5 + $0x10] sm:$0xff] %vm1340_vm4, %v3077_v1  ;;  %v3878_v62 = vpop.f32.mrb[2].mxu1  ;;  %v3841_v31 = vpop.f32.mrb[0].mxu0  ;;  %v2862_v3 = vsel %vm1307_vm3, %v5303_v41, %v2190_v22 }
 0x185   : > { %3767 = vst.msk [vmem:[%s5727_s5 + $0x38] sm:$0xff] %vm1340_vm4, %v3878_v62  ;;  %v900_v38 = vpop.permute.xlu1 %899  ;;  %1684 = vst.msk [vmem:[%s5727_s5 + $0x20] sm:$0xff] %vm1340_vm4, %v3841_v31  ;;  %v3080_v47 = vpop.f32.mrb[3].mxu1 }
 0x186   : > { %3765 = vst.msk [vmem:[%s5727_s5 + $0x18] sm:$0xff] %vm1340_vm4, %v3080_v47  ;;  %v1555_v49 = vpop.f32.mrb[1].mxu0  ;;  %v1399_v51 = vsel %vm1373_vm5, %v1366_v45, %v900_v38 }
 0x187   : > { %1682 = vst.msk [vmem:[%s5727_s5] sm:$0xff] %vm1340_vm4, %v1555_v49  ;;  %v3842_v17 = vpop.f32.mrb[2].mxu0  ;;  %v790_v21 = vpop.permute.xlu0 %789 }
 0x188   : > { %1685 = vst.msk [vmem:[%s5727_s5 + $0x28] sm:$0xff] %vm1340_vm4, %v3842_v17  ;;  %v1558_v19 = vpop.f32.mrb[3].mxu0  ;;  %v1368_v41 = vsel %vm1340_vm4, %v1335_v60, %v790_v21 }
 0x189   : > { %1683 = vst.msk [vmem:[%s5727_s5 + $0x8] sm:$0xff] %vm1340_vm4, %v1558_v19  ;;  %v2428_v58 = vpop.permute.xlu1 %2427 }
 0x18a   : > { %v2924_v40 = vsel %vm1373_vm5, %v2892_v36, %v2428_v58 }
 0x18b   : > { %v2318_v30 = vpop.permute.xlu0 %2317 }
 0x18c   : > { %v2894_v24 = vsel %vm1340_vm4, %v2862_v3, %v2318_v30 }
 0x18d   : > { %v1172_v28 = vpop.permute.xlu1 %1171 }
 0x18e   : > { %v1432_v34 = vsel %vm1406_vm6, %v1399_v51, %v1172_v28 }
 0x18f   : > { %v902_v61 = vpop.permute.xlu0 %901 }
 0x190   : > { %v1401_v43 = vsel %vm1373_vm5, %v1368_v41, %v902_v61 }
 0x191   : > { %v2700_v56 = vpop.permute.xlu1 %2699 }
 0x192   : > { %v2956_v5 = vsel %vm1406_vm6, %v2924_v40, %v2700_v56 }
 0x193   : > { %v2430_v9 = vpop.permute.xlu0 %2429 }
 0x194   : > { %v2926_v0 = vsel %vm1373_vm5, %v2894_v24, %v2430_v9 }
 0x195   : > { %v1300_v44 = vpop.permute.xlu1 %1299 }
 0x196   : > { %v1465_v54 = vsel %vm1439_vm7, %v1432_v34, %v1300_v44 }
 0x197   : > { %3863 = vmatprep.mubr.msk.bf16.mxu0 %vm1484_vm8, %v1465_v54  ;;  %v1174_v57 = vpop.permute.xlu0 %1173 }
 0x198   : > { %v1434_v27 = vsel %vm1406_vm6, %v1401_v43, %v1174_v57 }
 0x199   : > { %v2828_v11 = vpop.permute.xlu1 %2827 }
 0x19a   : > { %v2988_v20 = vsel %vm1439_vm7, %v2956_v5, %v2828_v11 }
 0x19b   : > { %3899 = vmatprep.mubr.msk.bf16.mxu1 %vm1484_vm8, %v2988_v20  ;;  %v2702_v10 = vpop.permute.xlu0 %2701 }
 0x19c   : > { %v2958_v23 = vsel %vm1406_vm6, %v2926_v0, %v2702_v10 }
 0x19d   : > { %v2830_v46 = vpop.permute.xlu1 %2829 }
 0x19e   : > { %v2990_v33 = vsel %vm1439_vm7, %v2958_v23, %v2830_v46 }
 0x19f   : > { %3900 = vmatmul.mubr.msk.bf16.gmra.mrb[24].mxu1 %vm1484_vm8, %v2990_v33  ;;  %v1302_v6 = vpop.permute.xlu0 %1301 }
 0x1a0   : > { %v1467_v8 = vsel %vm1439_vm7, %v1434_v27, %v1302_v6 }
 0x1a1   : > { %v2192_v50 = vpop.permute.xlu1 %2191  ;;  %3864 = vmatmul.mubr.msk.bf16.gmra.mrb[24].mxu0 %vm1484_vm8, %v1467_v8 }
 0x1a2   : > { %v2864_v19 = vsel %vm1307_vm3, %v5445_v25, %v2192_v50 }
 0x1a3   : > { %v663_v48 = vpop.permute.xlu0 %662 }
 0x1a4   : > { %v1337_v62 = vsel %vm1307_vm3, %v5452_v63, %v663_v48 }
 0x1a5   : > { %v792_v14 = vpop.permute.xlu1 %791 }
 0x1a6   : > { %v1370_v38 = vsel %vm1340_vm4, %v1337_v62, %v792_v14 }
 0x1a7   : > { %v665_v7 = vpop.permute.xlu0 %664 }
 0x1a8   : > { %v1339_v34 = vsel %vm1307_vm3, %v5492_v29, %v665_v7 }
 0x1a9   : > { %v2320_v35 = vpop.permute.xlu1 %2319 }
 0x1aa   : > { %v3881_v37 = vpop.f32.mrb[4].mxu1  ;;  %v2896_v30 = vsel %vm1340_vm4, %v2864_v19, %v2320_v35 }
 0x1ab   : > { %3770 = vst.msk [vmem:[%s5727_s5 + $0x70] sm:$0xff] %vm1340_vm4, %v3881_v37  ;;  %v3093_v32 = vpop.f32.mrb[5].mxu1  ;;  %v2194_v42 = vpop.permute.xlu0 %2193 }
 0x1ac   : > { %3768 = vst.msk [vmem:[%s5727_s5 + $0x50] sm:$0xff] %vm1340_vm4, %v3093_v32  ;;  %v3882_v39 = vpop.f32.mrb[6].mxu1  ;;  %v3845_v13 = vpop.f32.mrb[4].mxu0  ;;  %v2866_v61 = vsel %vm1307_vm3, %v5522_v2, %v2194_v42 }
 0x1ad   : > { %3771 = vst.msk [vmem:[%s5727_s5 + $0x78] sm:$0xff] %vm1340_vm4, %v3882_v39  ;;  %v904_v15 = vpop.permute.xlu1 %903  ;;  %1688 = vst.msk [vmem:[%s5727_s5 + $0x60] sm:$0xff] %vm1340_vm4, %v3845_v13  ;;  %v3096_v26 = vpop.f32.mrb[7].mxu1 }
 0x1ae   : > { %3769 = vst.msk [vmem:[%s5727_s5 + $0x58] sm:$0xff] %vm1340_vm4, %v3096_v26  ;;  %v1571_v53 = vpop.f32.mrb[5].mxu0  ;;  %v1403_v49 = vsel %vm1373_vm5, %v1370_v38, %v904_v15 }
 0x1af   : > { %1686 = vst.msk [vmem:[%s5727_s5 + $0x40] sm:$0xff] %vm1340_vm4, %v1571_v53  ;;  %v3846_v52 = vpop.f32.mrb[6].mxu0  ;;  %v794_v16 = vpop.permute.xlu0 %793 }
 0x1b0   : > { %1689 = vst.msk [vmem:[%s5727_s5 + $0x68] sm:$0xff] %vm1340_vm4, %v3846_v52  ;;  %v1574_v59 = vpop.f32.mrb[7].mxu0  ;;  %v1372_v2 = vsel %vm1340_vm4, %v1339_v34, %v794_v16 }
 0x1b1   : > { %1687 = vst.msk [vmem:[%s5727_s5 + $0x48] sm:$0xff] %vm1340_vm4, %v1574_v59  ;;  %v2432_v4 = vpop.permute.xlu1 %2431 }
 0x1b2   : > { %v2928_v63 = vsel %vm1373_vm5, %v2896_v30, %v2432_v4 }
 0x1b3   : > { %v2322_v55 = vpop.permute.xlu0 %2321 }
 0x1b4   : > { %v2898_v45 = vsel %vm1340_vm4, %v2866_v61, %v2322_v55 }
 0x1b5   : > { %v1176_v1 = vpop.permute.xlu1 %1175 }
 0x1b6   : > { %v1436_v17 = vsel %vm1406_vm6, %v1403_v49, %v1176_v1 }
 0x1b7   : > { %v906_v22 = vpop.permute.xlu0 %905 }
 0x1b8   : > { %v1405_v54 = vsel %vm1373_vm5, %v1372_v2, %v906_v22 }
 0x1b9   : > { %v2704_v31 = vpop.permute.xlu1 %2703 }
 0x1ba   : > { %v2960_v18 = vsel %vm1406_vm6, %v2928_v63, %v2704_v31 }
 0x1bb   : > { %v2434_v47 = vpop.permute.xlu0 %2433 }
 0x1bc   : > { %v2930_v25 = vsel %vm1373_vm5, %v2898_v45, %v2434_v47 }
 0x1bd   : > { %v1304_v21 = vpop.permute.xlu1 %1303 }
 0x1be   : > { %v1469_v58 = vsel %vm1439_vm7, %v1436_v17, %v1304_v21 }
 0x1bf   : > { %3867 = vmatprep.mubr.msk.bf16.mxu0 %vm1484_vm8, %v1469_v58  ;;  %v1178_v28 = vpop.permute.xlu0 %1177 }
 0x1c0   : > { %v1438_v57 = vsel %vm1406_vm6, %v1405_v54, %v1178_v28 }
 0x1c1   : > { %v2832_v56 = vpop.permute.xlu1 %2831 }
 0x1c2   : > { %v2992_v9 = vsel %vm1439_vm7, %v2960_v18, %v2832_v56 }
 0x1c3   : > { %3903 = vmatprep.mubr.msk.bf16.mxu1 %vm1484_vm8, %v2992_v9  ;;  %v2706_v51 = vpop.permute.xlu0 %2705 }
 0x1c4   : > { %v2962_v44 = vsel %vm1406_vm6, %v2930_v25, %v2706_v51 }
 0x1c5   : > { %v2834_v12 = vpop.permute.xlu1 %2833 }
 0x1c6   : > { %v2994_v36 = vsel %vm1439_vm7, %v2962_v44, %v2834_v12 }
 0x1c7   : > { %3904 = vmatmul.mubr.msk.bf16.gmra.mrb[28].mxu1 %vm1484_vm8, %v2994_v36  ;;  %v1306_v40 = vpop.permute.xlu0 %1305 }
 0x1c8   : > { %v1471_v29 = vsel %vm1439_vm7, %v1438_v57, %v1306_v40 }
 0x1c9   : > { %3868 = vmatmul.mubr.msk.bf16.gmra.mrb[28].mxu0 %vm1484_vm8, %v1471_v29 }
 0x1d2   : > { %v3885_v3 = vpop.f32.mrb[8].mxu1 }
 0x1d3   : > { %3774 = vst.msk [vmem:[%s5727_s5 + $0xb0] sm:$0xff] %vm1340_vm4, %v3885_v3  ;;  %v3109_v5 = vpop.f32.mrb[9].mxu1 }
 0x1d4   : > { %3772 = vst.msk [vmem:[%s5727_s5 + $0x90] sm:$0xff] %vm1340_vm4, %v3109_v5  ;;  %v3886_v11 = vpop.f32.mrb[10].mxu1  ;;  %v3849_v24 = vpop.f32.mrb[8].mxu0 }
 0x1d5   : > { %3775 = vst.msk [vmem:[%s5727_s5 + $0xb8] sm:$0xff] %vm1340_vm4, %v3886_v11  ;;  %1692 = vst.msk [vmem:[%s5727_s5 + $0xa0] sm:$0xff] %vm1340_vm4, %v3849_v24  ;;  %v3112_v20 = vpop.f32.mrb[11].mxu1  ;;  %v1587_v0 = vpop.f32.mrb[9].mxu0 }
 0x1d6   : > { %3773 = vst.msk [vmem:[%s5727_s5 + $0x98] sm:$0xff] %vm1340_vm4, %v3112_v20  ;;  %1690 = vst.msk [vmem:[%s5727_s5 + $0x80] sm:$0xff] %vm1340_vm4, %v1587_v0  ;;  %v3850_v10 = vpop.f32.mrb[10].mxu0 }
 0x1d7   : > { %1693 = vst.msk [vmem:[%s5727_s5 + $0xa8] sm:$0xff] %vm1340_vm4, %v3850_v10  ;;  %v1590_v60 = vpop.f32.mrb[11].mxu0 }
 0x1d8   : > { %1691 = vst.msk [vmem:[%s5727_s5 + $0x88] sm:$0xff] %vm1340_vm4, %v1590_v60 }
 0x1fa   : > { %v3889_v23 = vpop.f32.mrb[12].mxu1 }
 0x1fb   : > { %3778 = vst.msk [vmem:[%s5727_s5 + $0xf0] sm:$0xff] %vm1340_vm4, %v3889_v23  ;;  %v3125_v41 = vpop.f32.mrb[13].mxu1 }
 0x1fc   : > { %3776 = vst.msk [vmem:[%s5727_s5 + $0xd0] sm:$0xff] %vm1340_vm4, %v3125_v41  ;;  %v3890_v46 = vpop.f32.mrb[14].mxu1  ;;  %v3853_v43 = vpop.f32.mrb[12].mxu0 }
 0x1fd   : > { %3779 = vst.msk [vmem:[%s5727_s5 + $0xf8] sm:$0xff] %vm1340_vm4, %v3890_v46  ;;  %1696 = vst.msk [vmem:[%s5727_s5 + $0xe0] sm:$0xff] %vm1340_vm4, %v3853_v43  ;;  %v3128_v33 = vpop.f32.mrb[15].mxu1  ;;  %v1603_v27 = vpop.f32.mrb[13].mxu0 }
 0x1fe   : > { %3777 = vst.msk [vmem:[%s5727_s5 + $0xd8] sm:$0xff] %vm1340_vm4, %v3128_v33  ;;  %1694 = vst.msk [vmem:[%s5727_s5 + $0xc0] sm:$0xff] %vm1340_vm4, %v1603_v27  ;;  %v3854_v6 = vpop.f32.mrb[14].mxu0 }
 0x1ff   : > { %1697 = vst.msk [vmem:[%s5727_s5 + $0xe8] sm:$0xff] %vm1340_vm4, %v3854_v6  ;;  %v1606_v8 = vpop.f32.mrb[15].mxu0 }
 0x200   : > { %1695 = vst.msk [vmem:[%s5727_s5 + $0xc8] sm:$0xff] %vm1340_vm4, %v1606_v8 }
 0x222   : > { %v3893_v50 = vpop.f32.mrb[16].mxu1 }
 0x223   : > { %3782 = vst.msk [vmem:[%s5727_s5 + $0x130] sm:$0xff] %vm1340_vm4, %v3893_v50  ;;  %v3141_v48 = vpop.f32.mrb[17].mxu1 }
 0x224   : > { %3780 = vst.msk [vmem:[%s5727_s5 + $0x110] sm:$0xff] %vm1340_vm4, %v3141_v48  ;;  %v3894_v14 = vpop.f32.mrb[18].mxu1  ;;  %v3857_v7 = vpop.f32.mrb[16].mxu0 }
 0x225   : > { %3783 = vst.msk [vmem:[%s5727_s5 + $0x138] sm:$0xff] %vm1340_vm4, %v3894_v14  ;;  %1700 = vst.msk [vmem:[%s5727_s5 + $0x120] sm:$0xff] %vm1340_vm4, %v3857_v7  ;;  %v3144_v35 = vpop.f32.mrb[19].mxu1  ;;  %v1619_v37 = vpop.f32.mrb[17].mxu0 }
 0x226   : > { %3781 = vst.msk [vmem:[%s5727_s5 + $0x118] sm:$0xff] %vm1340_vm4, %v3144_v35  ;;  %1698 = vst.msk [vmem:[%s5727_s5 + $0x100] sm:$0xff] %vm1340_vm4, %v1619_v37  ;;  %v3858_v32 = vpop.f32.mrb[18].mxu0 }
 0x227   : > { %1701 = vst.msk [vmem:[%s5727_s5 + $0x128] sm:$0xff] %vm1340_vm4, %v3858_v32  ;;  %v1622_v42 = vpop.f32.mrb[19].mxu0 }
 0x228   : > { %1699 = vst.msk [vmem:[%s5727_s5 + $0x108] sm:$0xff] %vm1340_vm4, %v1622_v42 }
 0x24a   : > { %v3897_v39 = vpop.f32.mrb[20].mxu1 }
 0x24b   : > { %3786 = vst.msk [vmem:[%s5727_s5 + $0x170] sm:$0xff] %vm1340_vm4, %v3897_v39  ;;  %v3157_v13 = vpop.f32.mrb[21].mxu1 }
 0x24c   : > { %3784 = vst.msk [vmem:[%s5727_s5 + $0x150] sm:$0xff] %vm1340_vm4, %v3157_v13  ;;  %v3898_v15 = vpop.f32.mrb[22].mxu1  ;;  %v3861_v26 = vpop.f32.mrb[20].mxu0 }
 0x24d   : > { %3787 = vst.msk [vmem:[%s5727_s5 + $0x178] sm:$0xff] %vm1340_vm4, %v3898_v15  ;;  %1704 = vst.msk [vmem:[%s5727_s5 + $0x160] sm:$0xff] %vm1340_vm4, %v3861_v26  ;;  %v3160_v53 = vpop.f32.mrb[23].mxu1  ;;  %v1635_v52 = vpop.f32.mrb[21].mxu0 }
 0x24e   : > { %3785 = vst.msk [vmem:[%s5727_s5 + $0x158] sm:$0xff] %vm1340_vm4, %v3160_v53  ;;  %1702 = vst.msk [vmem:[%s5727_s5 + $0x140] sm:$0xff] %vm1340_vm4, %v1635_v52  ;;  %v3862_v16 = vpop.f32.mrb[22].mxu0 }
 0x24f   : > { %1705 = vst.msk [vmem:[%s5727_s5 + $0x168] sm:$0xff] %vm1340_vm4, %v3862_v16  ;;  %v1638_v59 = vpop.f32.mrb[23].mxu0 }
 0x250   : > { %1703 = vst.msk [vmem:[%s5727_s5 + $0x148] sm:$0xff] %vm1340_vm4, %v1638_v59 }
 0x272   : > { %v3901_v4 = vpop.f32.mrb[24].mxu1 }
 0x273   : > { %3790 = vst.msk [vmem:[%s5727_s5 + $0x1b0] sm:$0xff] %vm1340_vm4, %v3901_v4  ;;  %v3173_v55 = vpop.f32.mrb[25].mxu1 }
 0x274   : > { %3788 = vst.msk [vmem:[%s5727_s5 + $0x190] sm:$0xff] %vm1340_vm4, %v3173_v55  ;;  %v3902_v1 = vpop.f32.mrb[26].mxu1  ;;  %v3865_v22 = vpop.f32.mrb[24].mxu0 }
 0x275   : > { %3791 = vst.msk [vmem:[%s5727_s5 + $0x1b8] sm:$0xff] %vm1340_vm4, %v3902_v1  ;;  %1708 = vst.msk [vmem:[%s5727_s5 + $0x1a0] sm:$0xff] %vm1340_vm4, %v3865_v22  ;;  %v3176_v62 = vpop.f32.mrb[27].mxu1  ;;  %v1651_v31 = vpop.f32.mrb[25].mxu0 }
 0x276   : > { %3789 = vst.msk [vmem:[%s5727_s5 + $0x198] sm:$0xff] %vm1340_vm4, %v3176_v62  ;;  %1706 = vst.msk [vmem:[%s5727_s5 + $0x180] sm:$0xff] %vm1340_vm4, %v1651_v31  ;;  %v3866_v38 = vpop.f32.mrb[26].mxu0 }
 0x277   : > { %1709 = vst.msk [vmem:[%s5727_s5 + $0x1a8] sm:$0xff] %vm1340_vm4, %v3866_v38  ;;  %v1654_v47 = vpop.f32.mrb[27].mxu0 }
 0x278   : > { %1707 = vst.msk [vmem:[%s5727_s5 + $0x188] sm:$0xff] %vm1340_vm4, %v1654_v47 }
 0x29a   : > { %v3905_v49 = vpop.f32.mrb[28].mxu1 }
 0x29b   : > { %3794 = vst.msk [vmem:[%s5727_s5 + $0x1f0] sm:$0xff] %vm1340_vm4, %v3905_v49  ;;  %v3189_v17 = vpop.f32.mrb[29].mxu1 }
 0x29c   : > { %3792 = vst.msk [vmem:[%s5727_s5 + $0x1d0] sm:$0xff] %vm1340_vm4, %v3189_v17  ;;  %v3906_v21 = vpop.f32.mrb[30].mxu1  ;;  %v3869_v19 = vpop.f32.mrb[28].mxu0 }
 0x29d   : > { %3795 = vst.msk [vmem:[%s5727_s5 + $0x1f8] sm:$0xff] %vm1340_vm4, %v3906_v21  ;;  %1712 = vst.msk [vmem:[%s5727_s5 + $0x1e0] sm:$0xff] %vm1340_vm4, %v3869_v19  ;;  %v3192_v58 = vpop.f32.mrb[31].mxu1  ;;  %v1667_v30 = vpop.f32.mrb[29].mxu0 }
 0x29e   : > { %3793 = vst.msk [vmem:[%s5727_s5 + $0x1d8] sm:$0xff] %vm1340_vm4, %v3192_v58  ;;  %1710 = vst.msk [vmem:[%s5727_s5 + $0x1c0] sm:$0xff] %vm1340_vm4, %v1667_v30  ;;  %v3870_v28 = vpop.f32.mrb[30].mxu0 }
 0x29f   : > { %1713 = vst.msk [vmem:[%s5727_s5 + $0x1e8] sm:$0xff] %vm1340_vm4, %v3870_v28  ;;  %v1670_v63 = vpop.f32.mrb[31].mxu0 }
 0x2a0   : > { %1711 = vst.msk [vmem:[%s5727_s5 + $0x1c8] sm:$0xff] %vm1340_vm4, %v1670_v63 }
 0x2a1 PF: > { %s12_s11 = sadd.s32 1, %s4157_s11   ;;  %s5925_s9 = smov %s4153_s10 }
 0x2a2   : > { %p9_p5 = scmp.ge.s32.totalorder %s12_s11, 4   ;;  %s5926_s10 = smov %s5928_s12 }
 0x2a4   :  { %11 = sbr.rel (!%p9_p5) target bundleno = 2 (0x2), region = 62 }

</bundles_post_ra>
